<compile_context>
chip_gen: v7x
topology: tpu7x:2x2x1
jax: 0.10.0
libtpu: 0.0.40
codegen_flags: <defaults>
</compile_context>

<pallas_src>
import functools

import jax
import jax.numpy as jnp
from jax import lax
from jax.experimental import pallas as pl
from jax.experimental.pallas import tpu as pltpu

_PAD = 8  # extra all-ones rows appended to x; they carry the softmax denominator


def _self_attention_kernel(gamma_ref, xj_ref, xr_ref, m_ref, wh_ref, o_ref,
                           mj_sc, max_sc, acc_sc, *,
                           block_i, n_i, c, bf16_exp, approx_recip):
    # gamma_ref : SMEM (1,) f32
    # xj_ref    : (C, Tj)   f32   output-column tile of x (also the residual)
    # xr_ref    : (C+8, N)  bf16  resident slab of x; last 8 rows are ones
    # m_ref     : (C+8, C)  bf16  [wf^T wg / scale ; zeros]
    # wh_ref    : (C, C+8)  bf16  [wh , zeros]
    # o_ref     : (C, Tj)   f32
    # mj_sc     : (C+8, Tj) bf16  cached M @ x_j (keys for this j tile)
    # max_sc    : (1, Tj)   f32   running max over i
    # acc_sc    : (C+8, Tj) f32   running X @ P; rows C.. hold the sum of exp

    # --- per-tile prologue --------------------------------------------------
    xj16 = xj_ref[...].astype(jnp.bfloat16)
    mj = jnp.dot(m_ref[...], xj16, preferred_element_type=jnp.float32)
    mj_sc[...] = mj.astype(jnp.bfloat16)
    max_sc[...] = jnp.full_like(max_sc, -jnp.inf)
    acc_sc[...] = jnp.zeros_like(acc_sc)

    exp_dtype = jnp.bfloat16 if bf16_exp else jnp.float32

    # --- online softmax over the i (reduction) axis -------------------------
    @pl.loop(0, n_i)
    def _(i):
        start = pl.multiple_of(i * block_i, block_i)
        xi = xr_ref[:, pl.ds(start, block_i)]                      # (C+8, Ti) bf16
        # scores s[ii, jj] = sum_c x[c, i0+ii] * (M @ x_j)[c, jj]   (= q^T k)
        # Contraction over dim 0 of both operands -> MXU matmul with transposed
        # LHS; no per-step vxpose of the (C, Ti) tile.
        s = lax.dot_general(xi, mj_sc[...],
                            dimension_numbers=(((0,), (0,)), ((), ())),
                            preferred_element_type=jnp.float32)    # (Ti, Tj)
        m_prev = max_sc[...]                                       # (1, Tj)
        m_new = jnp.maximum(m_prev, jnp.max(s, axis=0, keepdims=True))
        alpha = jnp.exp(m_prev - m_new)                            # (1, Tj)
        p = jnp.exp((s - m_new).astype(exp_dtype)).astype(jnp.bfloat16)
        # Rows C..C+7 of xi are ones, so rows C..C+7 of the accumulator carry
        # the running sum of exp (denominator) -- folded into the MXU.
        acc_sc[...] = alpha * acc_sc[...] + jnp.dot(
            xi, p, preferred_element_type=jnp.float32)             # (C+8, Tj)
        max_sc[...] = m_new

    # --- epilogue: deferred normalization, wh projection, residual ----------
    acc = acc_sc[...]
    l = acc[c:c + 1, :]                                            # (1, Tj)
    if approx_recip:
        inv_l = pl.reciprocal(l, approx=True)                      # EUP
    else:
        inv_l = 1.0 / l
    att = (acc * inv_l).astype(jnp.bfloat16)                       # (C+8, Tj)
    out = jnp.dot(wh_ref[...], att, preferred_element_type=jnp.float32)  # (C, Tj)
    o_ref[...] = (gamma_ref[0] * out + xj_ref[...]).astype(o_ref.dtype)


def _pick_block(n, targets):
    for t in targets:
        if t <= n and n % t == 0:
            return t
    return n


def self_attention(x, wf, wg, wh, gamma, *, scaling=False,
                   block_j=None, block_i=None,
                   approx_recip=True, bf16_exp=None):
    """x: (B, C, H, W) f32 (NCHW). wf/wg: (Co, C), wh: (C, C), gamma: scalar."""
    b, c, h, w = x.shape
    n = h * w
    co = wf.shape[0]

    # j tile (output columns): large -> lane-dense stores, fewer grid steps and a
    # smaller HBM re-read if streaming were ever needed.  i tile: 256 fills the
    # 256-deep MXU on v6e/v7x and already exceeds the 128-deep v5e MXU.
    block_j = _pick_block(n, (512, 384, 256, 128)) if block_j is None else min(block_j, n)
    block_i = _pick_block(n, (256, 128)) if block_i is None else min(block_i, n)
    assert n % block_j == 0 and n % block_i == 0, "H*W must divide the tile sizes"

    if bf16_exp is None:
        # bf16 EUP exists on v6e/v7x; keep exp in f32 on v5e and older parts.
        kind = jax.devices()[0].device_kind.lower()
        bf16_exp = not any(v in kind for v in ("v2", "v3", "v4", "v5"))

    x32 = x.reshape(b, c, n).astype(jnp.float32)       # residual / j tiles (exact)
    # Resident bf16 slab with 8 appended ones rows (softmax-denominator rows).
    # TODO(synk): avoid this extra HBM materialization for tiny/latency-bound
    # shapes by casting in-kernel from the f32 input and/or aliasing x32 to the
    # output via input_output_aliases.
    xr = jnp.concatenate(
        [x32.astype(jnp.bfloat16), jnp.ones((b, _PAD, n), jnp.bfloat16)], axis=1)

    # Fuse f/g projections and the optional 1/sqrt(Co) scale:
    #   q^T k / scale = x^T (wf^T wg / scale) x
    m = jnp.dot(wf.astype(jnp.float32).T, wg.astype(jnp.float32))
    if scaling:
        m = m / jnp.sqrt(jnp.float32(co))
    m16 = jnp.concatenate([m, jnp.zeros((_PAD, c), jnp.float32)],
                          axis=0).astype(jnp.bfloat16)              # (C+8, C)
    wh16 = jnp.concatenate([wh.astype(jnp.float32),
                            jnp.zeros((c, _PAD), jnp.float32)],
                           axis=1).astype(jnp.bfloat16)             # (C, C+8)
    gamma_arr = jnp.reshape(jnp.asarray(gamma, jnp.float32), (1,))

    c_aug = c + _PAD
    n_i = n // block_i
    grid = (b, n // block_j)

    # Rough VMEM footprint (double-buffered pipeline blocks + scratch).
    vmem_est = (2 * c_aug * n * 2                       # resident bf16 slab
                + 2 * c * block_j * 4 * 2               # x_j f32 tiles + output tiles
                + 2 * (c_aug * c + c * c_aug) * 2       # M, wh
                + c_aug * block_j * (2 + 4) + 8 * block_j * 4)   # scratch
    vmem_limit = int(min(100 * 2**20, max(32 * 2**20, 2 * vmem_est)))
    # TODO(synk): for very large H*W where the resident slab does not fit VMEM,
    # fall back to streaming (C, Ti) i-tiles from HBM via a third grid axis.
    assert 2 * c_aug * n * 2 <= 24 * 2**20, "per-batch bf16 slab too large for VMEM residency"

    kernel = functools.partial(
        _self_attention_kernel, block_i=block_i, n_i=n_i, c=c,
        bf16_exp=bf16_exp, approx_recip=approx_recip)

    # TODO(synk): for tiny feature maps (N <= ~512, small B), block several batch
    # elements per grid step to amortize the ~0.35us per-step overhead.
    out_flat = pl.pallas_call(
        kernel,
        out_shape=jax.ShapeDtypeStruct((b, c, n), jnp.float32),
        grid=grid,
        in_specs=[
            pl.BlockSpec(memory_space=pltpu.MemorySpace.SMEM),               # gamma
            pl.BlockSpec((None, c, block_j), lambda bb, j: (bb, 0, j)),      # x f32, j tile
            pl.BlockSpec((None, c_aug, n), lambda bb, j: (bb, 0, 0)),        # resident bf16 slab
            pl.BlockSpec((c_aug, c), lambda bb, j: (0, 0)),                  # M (zero-padded rows)
            pl.BlockSpec((c, c_aug), lambda bb, j: (0, 0)),                  # wh (zero-padded cols)
        ],
        out_specs=pl.BlockSpec((None, c, block_j), lambda bb, j: (bb, 0, j)),
        scratch_shapes=[
            pltpu.VMEM((c_aug, block_j), jnp.bfloat16),   # cached M @ x_j
            pltpu.VMEM((1, block_j), jnp.float32),        # running max over i
            pltpu.VMEM((c_aug, block_j), jnp.float32),    # X @ P accumulator (+ sum rows)
        ],
        compiler_params=pltpu.CompilerParams(
            dimension_semantics=("parallel", "parallel"),
            vmem_limit_bytes=vmem_limit),
    )(gamma_arr, x32, xr, m16, wh16)
    return out_flat.reshape(b, c, h, w)


def self_attention_ref(x, wf, wg, wh, gamma, *, scaling=False):
    """Pure-JAX f32 reference mirroring the PyTorch forward."""
    b, c, h, w = x.shape
    n = h * w
    xf = x.reshape(b, c, n)
    q = jnp.einsum("oc,bcn->bon", wf, xf)
    k = jnp.einsum("oc,bcn->bon", wg, xf)
    v = jnp.einsum("oc,bcn->bon", wh, xf)
    att = jnp.einsum("bdi,bdj->bij", q, k)
    if scaling:
        att = att / jnp.sqrt(jnp.float32(wf.shape[0]))
    att = jax.nn.softmax(att, axis=1)   # dim=1 in PyTorch
    out = jnp.einsum("bci,bij->bcj", v, att)
    out = gamma * out + xf
    return out.reshape(b, c, h, w)


if __name__ == "__main__":
    B, C, H, W = 2, 32, 16, 16          # in_channels=32 -> out_channels = 32 // 8 = 4
    Co = C // 8

    key = jax.random.PRNGKey(0)
    kx, kf, kg, kh = jax.random.split(key, 4)
    x = jax.random.normal(kx, (B, C, H, W), jnp.float32)
    # Conv1d kernel_size=1, bias=False -> weight (out, in, 1); keep the (out, in) slab.
    wf = 0.1 * jax.random.normal(kf, (Co, C), jnp.float32)
    wg = 0.1 * jax.random.normal(kg, (Co, C), jnp.float32)
    wh = 0.1 * jax.random.normal(kh, (C, C), jnp.float32)
    # gamma is initialized to 0 in the module; use a nonzero value so the
    # attention path actually contributes to the output.
    gamma = jnp.float32(0.5)

    for scaling in (False, True):
        out = self_attention(x, wf, wg, wh, gamma, scaling=scaling)
        jax.block_until_ready(out)
        ref = self_attention_ref(x, wf, wg, wh, gamma, scaling=scaling)
        assert out.shape == (B, C, H, W) and out.dtype == jnp.float32
        err = float(jnp.max(jnp.abs(out - ref)))
        # bf16 MXU operands / bf16 exp with f32 accumulation -> relaxed tolerance.
        assert bool(jnp.allclose(out, ref, rtol=5e-3, atol=5e-3)), (
            f"mismatch vs reference (scaling={scaling}): max abs err {err}")

    print("KERNEL_OK")
</pallas_src>

<mosaic_0001>
module attributes {stable_mosaic.version = 11 : i64} {
  func.func @_self_attention_kernel(%arg0: i32, %arg1: i32, %arg2: memref<1xf32, #tpu.memory_space<smem>>, %arg3: memref<1x32x256xf32, #tpu.memory_space<vmem>>, %arg4: memref<1x40x256xbf16, #tpu.memory_space<vmem>>, %arg5: memref<40x32xbf16, #tpu.memory_space<vmem>>, %arg6: memref<32x40xbf16, #tpu.memory_space<vmem>>, %arg7: memref<1x32x256xf32, #tpu.memory_space<vmem>>, %arg8: memref<40x256xbf16, #tpu.memory_space<vmem>>, %arg9: memref<1x256xf32, #tpu.memory_space<vmem>>, %arg10: memref<40x256xf32, #tpu.memory_space<vmem>>) attributes {dimension_semantics = [#tpu.dimension_semantics<parallel>, #tpu.dimension_semantics<parallel>], iteration_bounds = array<i64: 2, 1>, scalar_prefetch = 0 : i64, scratch_operands = 3 : i64, tpu.core_type = #tpu.core_type<tc>, window_params = [{transform_indices = @transform_0, window_bounds = array<i64: 1>}, {transform_indices = @transform_1, window_bounds = array<i64: 1, 32, 256>}, {transform_indices = @transform_2, window_bounds = array<i64: 1, 40, 256>}, {pipeline_mode = #tpu.pipeline_mode<synchronous>, transform_indices = @transform_3, window_bounds = array<i64: 40, 32>}, {pipeline_mode = #tpu.pipeline_mode<synchronous>, transform_indices = @transform_4, window_bounds = array<i64: 32, 40>}, {transform_indices = @transform_5, window_bounds = array<i64: 1, 32, 256>}]} {
    %c0 = arith.constant 0 : index
    %c0_0 = arith.constant 0 : index
    %c0_1 = arith.constant 0 : index
    %0 = vector.load %arg3[%c0, %c0_0, %c0_1] : memref<1x32x256xf32, #tpu.memory_space<vmem>>, vector<1x32x256xf32>
    %1 = vector.shape_cast %0 : vector<1x32x256xf32> to vector<32x256xf32>
    %2 = arith.truncf %1 : vector<32x256xf32> to vector<32x256xbf16>
    %c0_2 = arith.constant 0 : index
    %c0_3 = arith.constant 0 : index
    %3 = vector.load %arg5[%c0_2, %c0_3] : memref<40x32xbf16, #tpu.memory_space<vmem>>, vector<40x32xbf16>
    %cst = arith.constant dense<0.000000e+00> : vector<40x256xf32>
    %4 = tpu.matmul %3, %2, %cst {dimension_numbers = #tpu.dot_dimension_numbers<[1], [0], [0], [1], [0, 0, 1, 1], [], []>} : vector<40x32xbf16>, vector<32x256xbf16>, vector<40x256xf32> -> vector<40x256xf32>
    %5 = arith.truncf %4 : vector<40x256xf32> to vector<40x256xbf16>
    %c0_4 = arith.constant 0 : index
    %c0_5 = arith.constant 0 : index
    %6 = vector.load %arg8[%c0_4, %c0_5] : memref<40x256xbf16, #tpu.memory_space<vmem>>, vector<40x256xbf16>
    tpu.vector_store %arg8[%c0_4, %c0_5], %5 {strides = array<i32>} : memref<40x256xbf16, #tpu.memory_space<vmem>>, vector<40x256xbf16>,
    %cst_6 = arith.constant 0xFF800000 : f32
    %7 = vector.broadcast %cst_6 : f32 to vector<1x256xf32>
    %c0_7 = arith.constant 0 : index
    %c0_8 = arith.constant 0 : index
    %8 = vector.load %arg9[%c0_7, %c0_8] : memref<1x256xf32, #tpu.memory_space<vmem>>, vector<1x256xf32>
    tpu.vector_store %arg9[%c0_7, %c0_8], %7 {strides = array<i32>} : memref<1x256xf32, #tpu.memory_space<vmem>>, vector<1x256xf32>,
    %cst_9 = arith.constant 0.000000e+00 : f32
    %9 = vector.broadcast %cst_9 : f32 to vector<40x256xf32>
    %c0_10 = arith.constant 0 : index
    %c0_11 = arith.constant 0 : index
    %10 = vector.load %arg10[%c0_10, %c0_11] : memref<40x256xf32, #tpu.memory_space<vmem>>, vector<40x256xf32>
    tpu.vector_store %arg10[%c0_10, %c0_11], %9 {strides = array<i32>} : memref<40x256xf32, #tpu.memory_space<vmem>>, vector<40x256xf32>,
    %c0_i32 = arith.constant 0 : i32
    %c1_i32 = arith.constant 1 : i32
    %11 = arith.muli %c0_i32, %c1_i32 : i32
    %c0_i32_12 = arith.constant 0 : i32
    %12 = arith.addi %c0_i32_12, %11 : i32
    %c256_i32 = arith.constant 256 : i32
    %13 = arith.muli %12, %c256_i32 : i32
    %14 = tpu.assume_multiple %13, 256 : i32
    %c0_13 = arith.constant 0 : index
    %c0_14 = arith.constant 0 : index
    %15 = arith.index_cast %14 : i32 to index
    %16 = vector.load %arg4[%c0_13, %c0_14, %15] : memref<1x40x256xbf16, #tpu.memory_space<vmem>>, vector<1x40x256xbf16>
    %17 = vector.shape_cast %16 : vector<1x40x256xbf16> to vector<40x256xbf16>
    %c0_15 = arith.constant 0 : index
    %c0_16 = arith.constant 0 : index
    %18 = vector.load %arg8[%c0_15, %c0_16] : memref<40x256xbf16, #tpu.memory_space<vmem>>, vector<40x256xbf16>
    %cst_17 = arith.constant dense<0.000000e+00> : vector<256x256xf32>
    %19 = tpu.matmul %17, %18, %cst_17 {dimension_numbers = #tpu.dot_dimension_numbers<[0], [0], [1], [1], [0, 1, 1, 1], [], []>} : vector<40x256xbf16>, vector<40x256xbf16>, vector<256x256xf32> -> vector<256x256xf32>
    %c0_18 = arith.constant 0 : index
    %c0_19 = arith.constant 0 : index
    %20 = vector.load %arg9[%c0_18, %c0_19] : memref<1x256xf32, #tpu.memory_space<vmem>>, vector<1x256xf32>
    %cst_20 = arith.constant dense<0xFF800000> : vector<256xf32>
    %21 = vector.multi_reduction <maximumf>, %19, %cst_20 [0] : vector<256x256xf32> to vector<256xf32>
    %22 = vector.shape_cast %21 : vector<256xf32> to vector<1x256xf32>
    %23 = arith.maximumf %20, %22 : vector<1x256xf32>
    %24 = arith.subf %20, %23 : vector<1x256xf32>
    %25 = math.exp %24 : vector<1x256xf32>
    %26 = vector.broadcast %23 : vector<1x256xf32> to vector<256x256xf32>
    %27 = arith.subf %19, %26 : vector<256x256xf32>
    %28 = arith.truncf %27 : vector<256x256xf32> to vector<256x256xbf16>
    %29 = math.exp %28 : vector<256x256xbf16>
    %c0_21 = arith.constant 0 : index
    %c0_22 = arith.constant 0 : index
    %30 = vector.load %arg10[%c0_21, %c0_22] : memref<40x256xf32, #tpu.memory_space<vmem>>, vector<40x256xf32>
    %31 = vector.broadcast %25 : vector<1x256xf32> to vector<40x256xf32>
    %32 = arith.mulf %31, %30 : vector<40x256xf32>
    %cst_23 = arith.constant dense<0.000000e+00> : vector<40x256xf32>
    %33 = tpu.matmul %17, %29, %cst_23 {dimension_numbers = #tpu.dot_dimension_numbers<[1], [0], [0], [1], [0, 0, 1, 1], [], []>} : vector<40x256xbf16>, vector<256x256xbf16>, vector<40x256xf32> -> vector<40x256xf32>
    %34 = arith.addf %32, %33 : vector<40x256xf32>
    %c0_24 = arith.constant 0 : index
    %c0_25 = arith.constant 0 : index
    %35 = vector.load %arg10[%c0_24, %c0_25] : memref<40x256xf32, #tpu.memory_space<vmem>>, vector<40x256xf32>
    tpu.vector_store %arg10[%c0_24, %c0_25], %34 {strides = array<i32>} : memref<40x256xf32, #tpu.memory_space<vmem>>, vector<40x256xf32>,
    %c0_26 = arith.constant 0 : index
    %c0_27 = arith.constant 0 : index
    %36 = vector.load %arg9[%c0_26, %c0_27] : memref<1x256xf32, #tpu.memory_space<vmem>>, vector<1x256xf32>
    tpu.vector_store %arg9[%c0_26, %c0_27], %23 {strides = array<i32>} : memref<1x256xf32, #tpu.memory_space<vmem>>, vector<1x256xf32>,
    %c1_i32_28 = arith.constant 1 : i32
    %c0_29 = arith.constant 0 : index
    %c0_30 = arith.constant 0 : index
    %37 = vector.load %arg10[%c0_29, %c0_30] : memref<40x256xf32, #tpu.memory_space<vmem>>, vector<40x256xf32>
    %38 = vector.extract_strided_slice %37 {offsets = [32, 0], sizes = [1, 256], strides = [1, 1]} : vector<40x256xf32> to vector<1x256xf32>
    %39 = tpu.reciprocal %38 {approx = true} : vector<1x256xf32> -> vector<1x256xf32>
    %40 = vector.broadcast %39 : vector<1x256xf32> to vector<40x256xf32>
    %41 = arith.mulf %37, %40 : vector<40x256xf32>
    %42 = arith.truncf %41 : vector<40x256xf32> to vector<40x256xbf16>
    %c0_31 = arith.constant 0 : index
    %c0_32 = arith.constant 0 : index
    %43 = vector.load %arg6[%c0_31, %c0_32] : memref<32x40xbf16, #tpu.memory_space<vmem>>, vector<32x40xbf16>
    %cst_33 = arith.constant dense<0.000000e+00> : vector<32x256xf32>
    %44 = tpu.matmul %43, %42, %cst_33 {dimension_numbers = #tpu.dot_dimension_numbers<[1], [0], [0], [1], [0, 0, 1, 1], [], []>} : vector<32x40xbf16>, vector<40x256xbf16>, vector<32x256xf32> -> vector<32x256xf32>
    %c0_34 = arith.constant 0 : index
    %45 = memref.load %arg2[%c0_34] : memref<1xf32, #tpu.memory_space<smem>>
    %46 = vector.broadcast %45 : f32 to vector<32x256xf32>
    %47 = arith.mulf %46, %44 : vector<32x256xf32>
    %c0_35 = arith.constant 0 : index
    %c0_36 = arith.constant 0 : index
    %c0_37 = arith.constant 0 : index
    %48 = vector.load %arg3[%c0_35, %c0_36, %c0_37] : memref<1x32x256xf32, #tpu.memory_space<vmem>>, vector<1x32x256xf32>
    %49 = vector.shape_cast %48 : vector<1x32x256xf32> to vector<32x256xf32>
    %50 = arith.addf %47, %49 : vector<32x256xf32>
    %c0_38 = arith.constant 0 : index
    %c0_39 = arith.constant 0 : index
    %c0_40 = arith.constant 0 : index
    %51 = vector.load %arg7[%c0_38, %c0_39, %c0_40] : memref<1x32x256xf32, #tpu.memory_space<vmem>>, vector<1x32x256xf32>
    %52 = vector.shape_cast %51 : vector<1x32x256xf32> to vector<32x256xf32>
    %53 = vector.shape_cast %50 : vector<32x256xf32> to vector<1x32x256xf32>
    tpu.vector_store %arg7[%c0_38, %c0_39, %c0_40], %53 {strides = array<i32>} : memref<1x32x256xf32, #tpu.memory_space<vmem>>, vector<1x32x256xf32>,
    return
  }
  func.func @transform_0(%arg0: i32, %arg1: i32) -> i32 {
    %c0_i32 = arith.constant 0 : i32
    %c0_i32_0 = arith.constant 0 : i32
    return %c0_i32 : i32
  }
  func.func @transform_1(%arg0: i32, %arg1: i32) -> (i32, i32, i32) {
    %c0_i32 = arith.constant 0 : i32
    %c0_i32_0 = arith.constant 0 : i32
    return %arg0, %c0_i32, %arg1 : i32, i32, i32
  }
  func.func @transform_2(%arg0: i32, %arg1: i32) -> (i32, i32, i32) {
    %c0_i32 = arith.constant 0 : i32
    %c0_i32_0 = arith.constant 0 : i32
    %c0_i32_1 = arith.constant 0 : i32
    return %arg0, %c0_i32, %c0_i32_0 : i32, i32, i32
  }
  func.func @transform_3(%arg0: i32, %arg1: i32) -> (i32, i32) {
    %c0_i32 = arith.constant 0 : i32
    %c0_i32_0 = arith.constant 0 : i32
    %c0_i32_1 = arith.constant 0 : i32
    return %c0_i32, %c0_i32_0 : i32, i32
  }
  func.func @transform_4(%arg0: i32, %arg1: i32) -> (i32, i32) {
    %c0_i32 = arith.constant 0 : i32
    %c0_i32_0 = arith.constant 0 : i32
    %c0_i32_1 = arith.constant 0 : i32
    return %c0_i32, %c0_i32_0 : i32, i32
  }
  func.func @transform_5(%arg0: i32, %arg1: i32) -> (i32, i32, i32) {
    %c0_i32 = arith.constant 0 : i32
    %c0_i32_0 = arith.constant 0 : i32
    return %arg0, %c0_i32, %arg1 : i32, i32, i32
  }
}

</mosaic_0001>

<bundles_post_ra>
// kernel: tpu_custom_call.1
= control target key start
LH: loop header
LB: loop body
LE: loop exit
PB: predicated region body
PF: predicated region fallthrough
CT: control target
= control target key end

     0   :  { %s2666_s0 = inlined_call_operand.<no memory space> [shape: f32[1], index: 0, kind: input, shape index: {}]   ;;  %s2667_s1 = inlined_call_operand.hbm [shape: f32[2,32,256], index: 1, kind: input, shape index: {}]   ;;  %s2668_s2 = inlined_call_operand.hbm [shape: bf16[2,40,256], index: 2, kind: input, shape index: {}]   ;;  %s2669_s3 = inlined_call_operand.vmem [shape: bf16[40,32], index: 3, kind: input, shape index: {}]   ;;  %s2670_s4 = inlined_call_operand.vmem [shape: bf16[32,40], index: 4, kind: input, shape index: {}]   ;;  %s2671_s5 = inlined_call_operand.hbm [shape: f32[2,32,256], index: 5, kind: output, shape index: {}]  }
   0x1   :  { %10 = sst [smem:[#allocation5]] %s2666_s0 }
   0x2   :  { %11 = vsyncpa [#allocation7], 0 }
   0x3   :  { %13 = vsyncpa [#allocation7 + $0x1], 0 }
   0x4   :  { %14 = vsyncpa [#allocation10], 0 }
   0x5   :  { %16 = vsyncpa [#allocation10 + $0x1], 0 }
   0x6   :  { %17 = vsyncpa [#allocation8], 0 }
   0x7   :  { %19 = vsyncpa [#allocation8 + $0x1], 0  ;;  %s1918_s20 = smov 0   ;;  %s1920_s21 = smov 0  }
   0x8   :  { %s1922_s22 = smov 0   ;;  %s1924_s23 = smov 0  }
   0x9   :  { %s1926_s24 = smov 0   ;;  %s1928_s25 = smov 0  }
   0xa LB: > { %s1489_s0 = sadd.s32 4294967295, %s1871_s25   ;;  %s1490_s26 = sadd.s32 4294967294, %s1871_s25   ;;  %s1871_s25 = sphi %s1928_s25, %s25_s25   ;;  %s1867_s24 = sphi %s1926_s24, %s2824_s24   ;;  %s1863_s23 = sphi %s1924_s23, %s2823_s23   ;;  %s1859_s22 = sphi %s1922_s22, %s2822_s22   ;;  %s1855_s21 = sphi %s1920_s21, %s2821_s21   ;;  %s1851_s20 = sphi %s1918_s20, %s2820_s20  }
   0xb   : > { %s37_s27 = sadd.s32 1, %s1867_s24  ;;  %s67_s28 = sadd.s32 1, %s1859_s22 }
   0xc   : > { %p39_p0 = scmp.ge.s32.totalorder %s37_s27, 2  ;;  %p74_p1 = scmp.ne.s32.totalorder %s1859_s22, %s1855_s21 }
   0xd   : > { %p75_p2 = scmp.eq.s32.totalorder %s1871_s25, 0  ;;  %p80_p3 = scmp.ne.s32.totalorder %s1855_s21, %s1851_s20 }
   0xe   : > { %s2826_s27 = smov (%p39_p0, %s37_s27), 0  ;;  %p81_p5 = scmp.eq.s32.totalorder %s1489_s0, 0 }
   0xf   : > { %p1959_p4 = por %p75_p2, %p74_p1  ;;  %s62_s30 = ssub.s32 %s1867_s24, %s2826_s27 }
  0x10   : > { %p174_p6 = scmp.eq.s32.totalorder %s1489_s0, 1  ;;  %p65_p7 = scmp.eq.s32.totalorder %s62_s30, 0 }
  0x11   : > { %p1965_p8 = por %p81_p5, %p80_p3  ;;  %p180_p10 = scmp.eq.s32.totalorder %s1490_s26, 1 }
  0x12   : > { %p1969_p9 = por %p174_p6, %p74_p1  ;;  %p1583_p13 = scmp.lt.s32.totalorder %s1871_s25, 2 }
  0x13   : > { %s2720_s6 = scalar_select %p1965_p8, 1, 0 }
  0x14   : > { %s2721_s7 = scalar_select %p1969_p9, 1, 0 }
  0x15   : > { %s1974_s8 = scalar_select %p65_p7, %s1859_s22, %s67_s28  }
  0x16   : > { %p1976_p11 = por %p180_p10, %p80_p3  ;;  %s1983_s10 = sand.u32 1, %s1859_s22  }
  0x17   : > { %s1493_s11 = sshll.u32 %s1983_s10, 6  ;;  %s1550_s12 = sshll.u32 %s1867_s24, 10 }
  0x18   : > { %s2722_s9 = scalar_select %p1976_p11, 1, 0 }
  0x19   : > { %s1990_s15 = scalar_lea.hbm %s2667_s1, %s1550_s12  ;;  %s213_s16 = scalar_lea.vmem [#allocation6], %s1493_s11 }
  0x1a   : > { %s222_s17 = sshll.u32 %s213_s16, 4  ;;  %p1996_p0 = pnand %p1583_p13, %p1959_p4  ;;  %s1992_s17 = int_to_ptr.vmem [resolvable:$true] %s222_s17 }
  0x1b   : > { %s210_s19 = scalar_lea.sflag [#allocation7], %s1983_s10  ;;  %s1725_s0 = scalar_lea.hbm %s1990_s15, 1024 }
  0x1c   : > { %p1726_p2 = scmp.ne.s32.totalorder %s1990_s15, %s1725_s0  ;;  %p1727_p3 = pneg %p1996_p0 }
  0x1d   : > { %s1730_s29 = scalar_lea.hbm %s2667_s1, 2048  ;;  %p1731_p4 = scmp.lt.u32.totalorder %s1990_s15, %s2667_s1 }
  0x1e   : > { %p1728_p5 = pnand %p1727_p3, %p1726_p2  ;;  %p1732_p7 = scmp.lt.u32.totalorder %s1730_s29, %s1725_s0 }
  0x1f   : > { %p1734_p13 = scmp.lt.u32.totalorder %s1725_s0, %s1990_s15 }
  0x20   : > { %p1729_p6 = pneg %p1728_p5  ;;  %p1733_p10 = por %p1732_p7, %p1731_p4 }
  0x22   : > { %p1735_p12 = por %p1734_p13, %p1733_p10 }
  0x24   : > { %p1736_p1 = pnand %p1735_p12, %p1729_p6 }
  0x26   : > { %1739 = shalt.err (!%p1736_p1)
}
  0x27   : > { %s1740_s12 = scalar_lea.vmem %s1992_s17, 1024  ;;  %s1873_s13 = smov [#allocation6]  }
  0x28   : > { %p1741_p2 = scmp.ne.s32.totalorder %s1992_s17, %s1740_s12  ;;  %s1745_s14 = sshll.u32 %s1873_s13, 4  ;;  %s1746_s14 = int_to_ptr.vmem [resolvable:$false] %s1745_s14 }
  0x29   : > { %s1747_s16 = scalar_lea.vmem %s1746_s14, 2048  ;;  %p1748_p9 = scmp.lt.s32.totalorder %s1992_s17, %s1746_s14 }
  0x2a   : > { %p1743_p5 = pnand %p1741_p2, %p1727_p3  ;;  %p1749_p4 = scmp.lt.s32.totalorder %s1747_s16, %s1740_s12 }
  0x2c   : > { %p1744_p11 = pneg %p1743_p5  ;;  %p1750_p7 = por %p1749_p4, %p1748_p9 }
  0x2e   : > { %p1751_p10 = pnand %p1750_p7, %p1744_p11 }
  0x30   : > { %1754 = shalt.err (!%p1751_p10)
}
  0x31   : > { %s1874_s0 = smov 256   ;;  %s1875_s26 = smov 16  }
  0x32   : > { %1575 = dma.hbm_to_vmem [thread:$0]  (!%p1996_p0), %s1990_s15, 1024, %s1992_s17, %s210_s19, %s1874_s0, %s1874_s0, %s1875_s26  }
  0x33   : > { %p251_p12 = scmp.lt.s32.totalorder %s1871_s25, 3  ;;  %s1563_s28 = smul.u32 40, %s1983_s10 }
  0x34   : > { %p2724_p9 = scmp.ge.s32.totalorder %s1871_s25, 1  ;;  %s1564_s30 = smul.u32 640, %s1867_s24 }
  0x35   : > { %s236_s14 = scalar_lea.vmem [#allocation9], %s1563_s28  ;;  %s233_s15 = scalar_lea.sflag [#allocation10], %s1983_s10 }
  0x36   : > { %p2033_p11 = pnand %p2724_p9, %p251_p12  ;;  %s2041_s13 = scalar_lea.hbm %s2668_s2, %s1564_s30 }
  0x37   : > { %s243_s16 = sshll.u32 %s236_s14, 4  ;;  %s1755_s17 = scalar_lea.hbm %s2041_s13, 640  ;;  %s2043_s16 = int_to_ptr.vmem [resolvable:$true] %s243_s16 }
  0x38   : > { %p1756_p1 = scmp.ne.s32.totalorder %s2041_s13, %s1755_s17  ;;  %s1760_s26 = scalar_lea.hbm %s2668_s2, 1280 }
  0x39   : > { %p1761_p2 = scmp.lt.u32.totalorder %s2041_s13, %s2668_s2  ;;  %p1762_p5 = scmp.lt.u32.totalorder %s1760_s26, %s1755_s17 }
  0x3a   : > { %p1758_p6 = pnand %p1756_p1, %p1727_p3  ;;  %p1764_p7 = scmp.lt.u32.totalorder %s1755_s17, %s2041_s13 }
  0x3b   : > { %p1763_p4 = por %p1762_p5, %p1761_p2 }
  0x3c   : > { %p1759_p13 = pneg %p1758_p6 }
  0x3d   : > { %p1765_p10 = por %p1764_p7, %p1763_p4 }
  0x3f   : > { %p1766_p12 = pnand %p1765_p10, %p1759_p13 }
  0x41   : > { %1769 = shalt.err (!%p1766_p12)
}
  0x42   : > { %s1770_s28 = scalar_lea.vmem %s2043_s16, 640  ;;  %s1876_s12 = smov [#allocation9]  }
  0x43   : > { %p1771_p9 = scmp.ne.s32.totalorder %s2043_s16, %s1770_s28  ;;  %s1775_s14 = sshll.u32 %s1876_s12, 4  ;;  %s1776_s14 = int_to_ptr.vmem [resolvable:$false] %s1775_s14 }
  0x44   : > { %s1777_s19 = scalar_lea.vmem %s1776_s14, 1280  ;;  %p1778_p8 = scmp.lt.s32.totalorder %s2043_s16, %s1776_s14 }
  0x45   : > { %p1773_p1 = pnand %p1771_p9, %p1727_p3  ;;  %p1779_p2 = scmp.lt.s32.totalorder %s1777_s19, %s1770_s28 }
  0x47   : > { %p1774_p6 = pneg %p1773_p1  ;;  %p1780_p5 = por %p1779_p2, %p1778_p8 }
  0x49   : > { %p1781_p4 = pnand %p1780_p5, %p1774_p6 }
  0x4b   : > { %1784 = shalt.err (!%p1781_p4)
}
  0x4c   : > { %s1877_s17 = smov 128   ;;  %s1878_s0 = smov 8  }
  0x4d   : > { %1578 = dma.hbm_to_vmem [thread:$0]  (!%p1996_p0), %s2041_s13, 640, %s2043_s16, %s233_s15, %s1877_s17, %s1877_s17, %s1878_s0  }
  0x4e   : > { %255 = sbr.rel (%p2033_p11) target bundleno = 1307 (0x51b), region = 40 }
  0x55   : > { %s2074_s26 = sand.u32 1, %s1855_s21   ;;  %p2726_p8 = scmp.ne.s32.totalorder %s2720_s6, 0 }
  0x56   : > { %s1498_s30 = sshll.u32 %s2074_s26, 6  ;;  %s258_s11 = scalar_lea.sflag [#allocation7], %s2074_s26 }
  0x57   : > { %s2080_s28 = scalar_lea.vmem [#allocation6], %s1498_s30 }
  0x58   : > { %1838 = dma.done.wait (%p2726_p8), %s258_s11, 1024  }
  0x59   : > { %1840 = vsyncadd (%p2726_p8), %s258_s11, 4294966272  ;;  %s1565_s10 = smul.u32 40, %s2074_s26  ;;  %s267_s18 = scalar_lea.sflag [#allocation10], %s2074_s26 }
  0x5b   : > { %s270_s29 = scalar_lea.vmem [#allocation9], %s1565_s10 }
  0x5c   : > { %1842 = dma.done.wait (%p2726_p8), %s267_s18, 640  }
  0x5d   : > { %1844 = vsyncadd (%p2726_p8), %s267_s18, 4294966656  ;;  %v2674_v0 = vmov 0   ;;  %v306_v1 = vld [vmem:[%s2080_s28 + $0x8] sm:$0xff]  ;;  %v308_v2 = vld [vmem:[%s2080_s28 + $0x18] sm:$0xff]  ;;  %vm335_vm0 = vcmask 261120   ;;  %vm601_vm1 = vcmask 1043456   ;;  %v2676_v62 = vlaneseq }
  0x5e   : > { %377 = vmatprep.mubr.bf16.mxu0 %v2674_v0  ;;  %640 = vmatprep.mubr.bf16.mxu1 %v2674_v0  ;;  %v305_v3 = vld [vmem:[%s2080_s28] sm:$0xff]  ;;  %v314_v4 = vpack.c.bf16 %v308_v2, %v306_v1  ;;  %v307_v5 = vld [vmem:[%s2080_s28 + $0x10] sm:$0xff]  ;;  %v310_v6 = vld [vmem:[%s2080_s28 + $0x28] sm:$0xff]  ;;  %vm552_vm2 = vcmask 326656   ;;  %s1329_s10 = sld [smem:[#allocation5]]  ;;  %s301_s18 = scalar_lea.vmem [#allocation11], %s1498_s30 }
  0x5f   : > { %v312_v7 = vld [vmem:[%s2080_s28 + $0x38] sm:$0xff]  ;;  %v313_v8 = vpack.c.bf16 %v307_v5, %v305_v3  ;;  %v309_v10 = vld [vmem:[%s2080_s28 + $0x20] sm:$0xff]  ;;  %v311_v11 = vld [vmem:[%s2080_s28 + $0x30] sm:$0xff]  ;;  %vm2179_vm3 = vcmp.lt.s32.totalorder %v2676_v62, 256  ;;  %s1556_s6 = sshll.u32 %s1863_s23, 10  ;;  %s1364_s23 = scalar_lea.sflag [#allocation8], %s2074_s26 }
  0x60   : > { %v316_v9 = vpack.c.bf16 %v312_v7, %v310_v6  ;;  %345 = vmatprep.subr.bf16.mxu0 %v314_v4  ;;  %v315_v12 = vpack.c.bf16 %v311_v11, %v309_v10  ;;  %v2102_v13 = vld [vmem:[%s270_s29] ss:$8 sps:$4 sm:$0xff]   ;;  %v2107_v15 = vld [vmem:[%s270_s29 + $0x10] ss:$8 sps:$4 sm:$0xff]   ;;  %v1650_v16 = vld [vmem:[%s270_s29 + $0x4] ss:$8 sps:$4 sm:$0xff]   ;;  %s2617_s16 = scalar_lea.hbm %s2671_s5, %s1556_s6 }
  0x61   : > { %346 = vmatpush1.bf16.msra.mxu0 %v313_v8  ;;  %2727 = vst [vmem:[#allocation15_spill] sm:$0xff] %v2102_v13  ;;  %v1642_v14 = vld [vmem:[%s2669_s3] sm:$0xff]   ;;  %2728 = vst [vmem:[#allocation16_spill] sm:$0xff] %v2107_v15  ;;  %495 = vxpose.xlu0.c.b16.start [1/3] (short) %v2102_v13, 128  ;;  %v1643_v21 = vld [vmem:[%s2669_s3 + $0x8] sm:$0xff]   ;;  %v1880_v6 = vmov -inf   ;;  %p2817_p3 = scmp.ne.s32.totalorder %s2721_s7, 0 }
  0x62   : > { %347 = vmatprep.subr.bf16.mxu0 %v316_v9  ;;  %v462_v17 = vld [vmem:[%s270_s29 + $0x20] sm:$0xff]  ;;  %511 = vxpose.xlu1.c.b16.start [1/3] (short) %v1650_v16, 128  ;;  %v2110_v18 = vld [vmem:[%s270_s29 + $0x14] ss:$8 sps:$4 sm:$0xff]   ;;  %447 = vst.msk [vmem:[#allocation3] sm:$0x3] %vm2179_vm3, %v1880_v6  ;;  %s1379_s29 = sshll.u32 %s301_s18, 4  ;;  %s2612_s29 = int_to_ptr.vmem [resolvable:$true] %s1379_s29 }
  0x63   : > { %2729 = vst [vmem:[#allocation17_spill] sm:$0xff] %v2110_v18  ;;  %v2115_v19 = vcombine.low %v462_v17, %v462_v17  ;;  %v2118_v20 = vcombine.high %v462_v17, %v462_v17  ;;  %v1644_v22 = vld [vmem:[%s2669_s3 + $0x10] ss:$0 sps:$4 sm:$0xff]   ;;  %s1882_s15 = smov [#allocation11]  }
  0x64   : > { %s1789_s12 = sshll.u32 %s1882_s15, 4  ;;  %s1790_s12 = int_to_ptr.vmem [resolvable:$false] %s1789_s12 }
  0x65   : > { %348 = vmatpush1.bf16.msra.mxu0 %v315_v12  ;;  %496 = vxpose.xlu0.c.b16.cont [2/3] (short) %v2107_v15, 128  ;;  %2730 = vst [vmem:[#allocation18_spill] sm:$0xff] %v2115_v19  ;;  %2731 = vst [vmem:[#allocation19_spill] sm:$0xff] %v2118_v20  ;;  %s1791_s14 = scalar_lea.vmem %s1790_s12, 2048  ;;  %p1792_p7 = scmp.lt.s32.totalorder %s2612_s29, %s1790_s12 }
  0x66   : > { %512 = vxpose.xlu1.c.b16.cont [2/3] (short) %v2110_v18, 128 }
  0x68   : > { %1503 = vmatmul.mubr.msk.bf16.vlgmr.msra.gmra.mrb[0].mxu0 %vm335_vm0, %v1642_v14 }
  0x69   : > { %387 = vmatprep.mubr.bf16.mxu0 %v2674_v0  ;;  %497 = vxpose.xlu0.c.b16.end [3/3] (short) %v2115_v19, 128 }
  0x6a   : > { %513 = vxpose.xlu1.c.b16.end [3/3] (short) %v2118_v20, 128 }
  0x70   : > { %1504 = vmatmul.mubr.msk.bf16.gmra.mrb[4].mxu0 %vm335_vm0, %v1643_v21 }
  0x71   : > { %397 = vmatprep.mubr.bf16.mxu0 %v2674_v0 }
  0x78   : > { %1505 = vmatmul.mubr.msk.bf16.gmra.mrb[8].mxu0 %vm335_vm0, %v1644_v22 }
  0x79   : > { %1164 = vmatprep.mubr.bf16.mxu0 %v1650_v16 }
  0xc7   : > { %v503_v42 = vpop.trf.xlu0 }
  0xc8   : > { %v519_v50 = vpop.trf.xlu1 }
  0xcb   : > { %v504_v43 = vpop.trf.xlu0 }
  0xcc   : > { %v520_v51 = vpop.trf.xlu1 }
  0xcf   : > { %v505_v44 = vpop.trf.xlu0 }
  0xd0   : > { %v521_v52 = vpop.trf.xlu1 }
  0xd3   : > { %v506_v45 = vpop.trf.xlu0 }
  0xd4   : > { %v522_v53 = vpop.trf.xlu1 }
  0xd7   : > { %v507_v46 = vpop.trf.xlu0 }
  0xd8   : > { %v523_v54 = vpop.trf.xlu1 }
  0xdb   : > { %v508_v47 = vpop.trf.xlu0 }
  0xdc   : > { %v524_v55 = vpop.trf.xlu1 }
  0xdf   : > { %v509_v48 = vpop.trf.xlu0 }
  0xe0   : > { %v525_v56 = vpop.trf.xlu1 }
  0xe3   : > { %v510_v49 = vpop.trf.xlu0 }
  0xe4   : > { %v526_v57 = vpop.trf.xlu1 }
 0x13b   : > { %v379_v23 = vpop.f32.mrb[0].mxu0 }
 0x13c   : > { %v381_v24 = vpop.f32.mrb[1].mxu0 }
 0x13d   : > { %v383_v25 = vpop.f32.mrb[2].mxu0 }
 0x13e   : > { %v1557_v26 = vpack.c.bf16 %v383_v25, %v379_v23  ;;  %v385_v27 = vpop.f32.mrb[3].mxu0 }
 0x13f   : > { %v1558_v28 = vpack.c.bf16 %v385_v27, %v381_v24 }
 0x141   : > { %608 = vmatprep.subr.bf16.mxu1 %v1558_v28 }
 0x142   : > { %609 = vmatpush1.bf16.msra.mxu1 %v1557_v26 }
 0x143   : > { %v389_v29 = vpop.f32.mrb[4].mxu0 }
 0x144   : > { %v391_v30 = vpop.f32.mrb[5].mxu0 }
 0x145   : > { %v393_v31 = vpop.f32.mrb[6].mxu0 }
 0x146   : > { %v1559_v32 = vpack.c.bf16 %v393_v31, %v389_v29  ;;  %v395_v33 = vpop.f32.mrb[7].mxu0 }
 0x147   : > { %v1560_v34 = vpack.c.bf16 %v395_v33, %v391_v30 }
 0x149   : > { %610 = vmatprep.subr.bf16.mxu1 %v1560_v34 }
 0x14a   : > { %611 = vmatpush1.bf16.msra.mxu1 %v1559_v32 }
 0x14b   : > { %v399_v35 = vpop.f32.mrb[8].mxu0 }
 0x14c   : > { %v1561_v36 = vpack.c.bf16 %v399_v35, %v399_v35  ;;  %v401_v37 = vpop.f32.mrb[9].mxu0 }
 0x14d   : > { %v1562_v38 = vpack.c.bf16 %v401_v37, %v401_v37  ;;  %v403_v39 = vpop.f32.mrb[10].mxu0 }
 0x14e   : > { %v404_v40 = vpop.f32.mrb[11].mxu0  ;;  %v603_v41 = vsel %vm601_vm1, %v1561_v36, 0 }
 0x14f   : > { %1523 = vmatprep.subr.msk.bf16.mxu1 %vm601_vm1, %v1562_v38 }
 0x150   : > { %613 = vmatpush1.bf16.msra.mxu1 %v603_v41 }
 0x153   : > { %1524 = vmatmul.mubr.msk.bf16.vlgmr.msra.gmra.mrb[0].mxu1 %vm552_vm2, %v503_v42 }
 0x154   : > { %650 = vmatprep.mubr.bf16.mxu1 %v2674_v0 }
 0x15b   : > { %1525 = vmatmul.mubr.msk.bf16.gmra.mrb[4].mxu1 %vm552_vm2, %v504_v43 }
 0x15c   : > { %660 = vmatprep.mubr.bf16.mxu1 %v2674_v0 }
 0x163   : > { %1526 = vmatmul.mubr.msk.bf16.gmra.mrb[8].mxu1 %vm552_vm2, %v505_v44 }
 0x164   : > { %670 = vmatprep.mubr.bf16.mxu1 %v2674_v0 }
 0x16b   : > { %1527 = vmatmul.mubr.msk.bf16.gmra.mrb[12].mxu1 %vm552_vm2, %v506_v45 }
 0x16c   : > { %680 = vmatprep.mubr.bf16.mxu1 %v2674_v0 }
 0x173   : > { %1528 = vmatmul.mubr.msk.bf16.gmra.mrb[16].mxu1 %vm552_vm2, %v507_v46 }
 0x174   : > { %690 = vmatprep.mubr.bf16.mxu1 %v2674_v0 }
 0x17b   : > { %1529 = vmatmul.mubr.msk.bf16.gmra.mrb[20].mxu1 %vm552_vm2, %v508_v47 }
 0x17c   : > { %700 = vmatprep.mubr.bf16.mxu1 %v2674_v0 }
 0x183   : > { %1530 = vmatmul.mubr.msk.bf16.gmra.mrb[24].mxu1 %vm552_vm2, %v509_v48 }
 0x184   : > { %710 = vmatprep.mubr.bf16.mxu1 %v2674_v0 }
 0x18b   : > { %1531 = vmatmul.mubr.msk.bf16.gmra.mrb[28].mxu1 %vm552_vm2, %v510_v49 }
 0x18c   : > { %720 = vmatprep.mubr.bf16.mxu1 %v2674_v0 }
 0x193   : > { %1532 = vmatmul.mubr.msk.bf16.gmra.mrb[32].mxu1 %vm552_vm2, %v519_v50 }
 0x194   : > { %730 = vmatprep.mubr.bf16.mxu1 %v2674_v0 }
 0x19b   : > { %1533 = vmatmul.mubr.msk.bf16.gmra.mrb[36].mxu1 %vm552_vm2, %v520_v51 }
 0x19c   : > { %740 = vmatprep.mubr.bf16.mxu1 %v2674_v0 }
 0x1a3   : > { %1534 = vmatmul.mubr.msk.bf16.gmra.mrb[40].mxu1 %vm552_vm2, %v521_v52 }
 0x1a4   : > { %750 = vmatprep.mubr.bf16.mxu1 %v2674_v0 }
 0x1ab   : > { %1535 = vmatmul.mubr.msk.bf16.gmra.mrb[44].mxu1 %vm552_vm2, %v522_v53 }
 0x1ac   : > { %760 = vmatprep.mubr.bf16.mxu1 %v2674_v0 }
 0x1b3   : > { %1536 = vmatmul.mubr.msk.bf16.gmra.mrb[48].mxu1 %vm552_vm2, %v523_v54 }
 0x1b4   : > { %770 = vmatprep.mubr.bf16.mxu1 %v2674_v0 }
 0x1bb   : > { %1537 = vmatmul.mubr.msk.bf16.gmra.mrb[52].mxu1 %vm552_vm2, %v524_v55 }
 0x1bc   : > { %780 = vmatprep.mubr.bf16.mxu1 %v2674_v0 }
 0x1c3   : > { %1538 = vmatmul.mubr.msk.bf16.gmra.mrb[56].mxu1 %vm552_vm2, %v525_v56 }
 0x1c4   : > { %790 = vmatprep.mubr.bf16.mxu1 %v2674_v0 }
 0x1cb   : > { %1539 = vmatmul.mubr.msk.bf16.gmra.mrb[60].mxu1 %vm552_vm2, %v526_v57 }
 0x226   : > { %v2164_v58 = vpop.f32.mrb[0].mxu1 }
 0x227   : > { %2732 = vst [vmem:[#allocation20_spill] sm:$0xff] %v2164_v58  ;;  %v2166_v59 = vpop.f32.mrb[1].mxu1 }
 0x228   : > { %2733 = vst [vmem:[#allocation21_spill] sm:$0xff] %v2166_v59  ;;  %v2168_v60 = vpop.f32.mrb[2].mxu1 }
 0x229   : > { %2734 = vst [vmem:[#allocation22_spill] sm:$0xff] %v2168_v60  ;;  %v2170_v61 = vpop.f32.mrb[3].mxu1 }
 0x22a   : > { %2735 = vst [vmem:[#allocation23_spill] sm:$0xff] %v2170_v61 }
 0x22e   : > { %v2172_v63 = vpop.f32.mrb[4].mxu1 }
 0x22f   : > { %2736 = vst [vmem:[#allocation24_spill] sm:$0xff] %v2172_v63  ;;  %v802_v1 = vmax.f32 %v2164_v58, %v2172_v63  ;;  %v2176_v2 = vpop.f32.mrb[5].mxu1 }
 0x230   : > { %v839_v4 = vmax.f32 %v2166_v59, %v2176_v2  ;;  %v2185_v5 = vpop.f32.mrb[6].mxu1 }
 0x231   : > { %v803_v7 = vmax.f32 %v2168_v60, %v2185_v5  ;;  %v2191_v8 = vpop.f32.mrb[7].mxu1 }
 0x232   : > { %v840_v9 = vmax.f32 %v2170_v61, %v2191_v8 }
 0x236   : > { %v2195_v10 = vpop.f32.mrb[8].mxu1 }
 0x237   : > { %v804_v11 = vmax.f32 %v802_v1, %v2195_v10  ;;  %v2198_v12 = vpop.f32.mrb[9].mxu1 }
 0x238   : > { %v841_v14 = vmax.f32 %v839_v4, %v2198_v12  ;;  %v2201_v16 = vpop.f32.mrb[10].mxu1 }
 0x239   : > { %v805_v17 = vmax.f32 %v803_v7, %v2201_v16  ;;  %v2204_v21 = vpop.f32.mrb[11].mxu1 }
 0x23a   : > { %v842_v22 = vmax.f32 %v840_v9, %v2204_v21 }
 0x23e   : > { %v2207_v23 = vpop.f32.mrb[12].mxu1 }
 0x23f   : > { %v806_v24 = vmax.f32 %v804_v11, %v2207_v23  ;;  %v2210_v25 = vpop.f32.mrb[13].mxu1 }
 0x240   : > { %v843_v26 = vmax.f32 %v841_v14, %v2210_v25  ;;  %v2213_v27 = vpop.f32.mrb[14].mxu1 }
 0x241   : > { %v807_v28 = vmax.f32 %v805_v17, %v2213_v27  ;;  %v2216_v29 = vpop.f32.mrb[15].mxu1 }
 0x242   : > { %v844_v30 = vmax.f32 %v842_v22, %v2216_v29 }
 0x246   : > { %v2219_v31 = vpop.f32.mrb[16].mxu1 }
 0x247   : > { %v808_v32 = vmax.f32 %v806_v24, %v2219_v31  ;;  %v2222_v33 = vpop.f32.mrb[17].mxu1 }
 0x248   : > { %v845_v34 = vmax.f32 %v843_v26, %v2222_v33  ;;  %v2225_v35 = vpop.f32.mrb[18].mxu1 }
 0x249   : > { %v809_v36 = vmax.f32 %v807_v28, %v2225_v35  ;;  %v2228_v37 = vpop.f32.mrb[19].mxu1 }
 0x24a   : > { %v846_v38 = vmax.f32 %v844_v30, %v2228_v37 }
 0x24e   : > { %v2231_v39 = vpop.f32.mrb[20].mxu1 }
 0x24f   : > { %v810_v40 = vmax.f32 %v808_v32, %v2231_v39  ;;  %v2234_v41 = vpop.f32.mrb[21].mxu1 }
 0x250   : > { %v847_v42 = vmax.f32 %v845_v34, %v2234_v41  ;;  %v2237_v43 = vpop.f32.mrb[22].mxu1 }
 0x251   : > { %v811_v44 = vmax.f32 %v809_v36, %v2237_v43  ;;  %v2240_v45 = vpop.f32.mrb[23].mxu1 }
 0x252   : > { %v848_v46 = vmax.f32 %v846_v38, %v2240_v45 }
 0x256   : > { %v2243_v47 = vpop.f32.mrb[24].mxu1 }
 0x257   : > { %v812_v48 = vmax.f32 %v810_v40, %v2243_v47  ;;  %v2246_v49 = vpop.f32.mrb[25].mxu1 }
 0x258   : > { %v849_v50 = vmax.f32 %v847_v42, %v2246_v49  ;;  %v2249_v51 = vpop.f32.mrb[26].mxu1 }
 0x259   : > { %v813_v52 = vmax.f32 %v811_v44, %v2249_v51  ;;  %v2252_v53 = vpop.f32.mrb[27].mxu1 }
 0x25a   : > { %v850_v54 = vmax.f32 %v848_v46, %v2252_v53 }
 0x25e   : > { %v2255_v55 = vpop.f32.mrb[28].mxu1 }
 0x25f   : > { %v814_v56 = vmax.f32 %v812_v48, %v2255_v55  ;;  %v2258_v57 = vpop.f32.mrb[29].mxu1 }
 0x260   : > { %v851_v1 = vmax.f32 %v849_v50, %v2258_v57  ;;  %v2261_v4 = vpop.f32.mrb[30].mxu1 }
 0x261   : > { %v815_v6 = vmax.f32 %v813_v52, %v2261_v4  ;;  %v2264_v7 = vpop.f32.mrb[31].mxu1 }
 0x262   : > { %v852_v9 = vmax.f32 %v850_v54, %v2264_v7 }
 0x266   : > { %v2267_v11 = vpop.f32.mrb[32].mxu1 }
 0x267   : > { %v816_v14 = vmax.f32 %v814_v56, %v2267_v11  ;;  %v2270_v17 = vpop.f32.mrb[33].mxu1 }
 0x268   : > { %v853_v22 = vmax.f32 %v851_v1, %v2270_v17  ;;  %v2273_v24 = vpop.f32.mrb[34].mxu1 }
 0x269   : > { %v817_v26 = vmax.f32 %v815_v6, %v2273_v24  ;;  %v2276_v28 = vpop.f32.mrb[35].mxu1 }
 0x26a   : > { %v854_v30 = vmax.f32 %v852_v9, %v2276_v28 }
 0x26e   : > { %v2279_v32 = vpop.f32.mrb[36].mxu1 }
 0x26f   : > { %v818_v34 = vmax.f32 %v816_v14, %v2279_v32  ;;  %v2282_v36 = vpop.f32.mrb[37].mxu1 }
 0x270   : > { %v855_v38 = vmax.f32 %v853_v22, %v2282_v36  ;;  %v2285_v40 = vpop.f32.mrb[38].mxu1 }
 0x271   : > { %2739 = vst [vmem:[#allocation25_spill] sm:$0xff] %v2285_v40  ;;  %v819_v42 = vmax.f32 %v817_v26, %v2285_v40  ;;  %v2288_v44 = vpop.f32.mrb[39].mxu1 }
 0x272   : > { %2740 = vst [vmem:[#allocation26_spill] sm:$0xff] %v2288_v44  ;;  %v856_v46 = vmax.f32 %v854_v30, %v2288_v44 }
 0x276   : > { %v2291_v48 = vpop.f32.mrb[40].mxu1 }
 0x277   : > { %2741 = vst [vmem:[#allocation27_spill] sm:$0xff] %v2291_v48  ;;  %v820_v50 = vmax.f32 %v818_v34, %v2291_v48  ;;  %v2294_v52 = vpop.f32.mrb[41].mxu1 }
 0x278   : > { %2742 = vst [vmem:[#allocation28_spill] sm:$0xff] %v2294_v52  ;;  %v857_v54 = vmax.f32 %v855_v38, %v2294_v52  ;;  %v2297_v56 = vpop.f32.mrb[42].mxu1 }
 0x279   : > { %2743 = vst [vmem:[#allocation29_spill] sm:$0xff] %v2297_v56  ;;  %v821_v1 = vmax.f32 %v819_v42, %v2297_v56  ;;  %v2300_v6 = vpop.f32.mrb[43].mxu1  ;;  %v1881_v56 = vmov 1966171168  }
 0x27a   : > { %2744 = vst [vmem:[#allocation30_spill] sm:$0xff] %v2300_v6  ;;  %v858_v9 = vmax.f32 %v856_v46, %v2300_v6 }
 0x27e   : > { %v2303_v14 = vpop.f32.mrb[44].mxu1 }
 0x27f   : > { %2745 = vst [vmem:[#allocation31_spill] sm:$0xff] %v2303_v14  ;;  %v822_v22 = vmax.f32 %v820_v50, %v2303_v14  ;;  %v2306_v26 = vpop.f32.mrb[45].mxu1 }
 0x280   : > { %2746 = vst [vmem:[#allocation32_spill] sm:$0xff] %v2306_v26  ;;  %v859_v30 = vmax.f32 %v857_v54, %v2306_v26  ;;  %v2309_v34 = vpop.f32.mrb[46].mxu1 }
 0x281   : > { %2747 = vst [vmem:[#allocation33_spill] sm:$0xff] %v2309_v34  ;;  %v823_v38 = vmax.f32 %v821_v1, %v2309_v34  ;;  %v2312_v0 = vpop.f32.mrb[47].mxu1 }
 0x282   : > { %2748 = vst [vmem:[#allocation34_spill] sm:$0xff] %v2312_v0  ;;  %v860_v42 = vmax.f32 %v858_v9, %v2312_v0 }
 0x286   : > { %v2315_v62 = vpop.f32.mrb[48].mxu1 }
 0x287   : > { %2749 = vst [vmem:[#allocation35_spill] sm:$0xff] %v2315_v62  ;;  %v824_v46 = vmax.f32 %v822_v22, %v2315_v62  ;;  %v2318_v19 = vpop.f32.mrb[49].mxu1 }
 0x288   : > { %2750 = vst [vmem:[#allocation36_spill] sm:$0xff] %v2318_v19  ;;  %v861_v50 = vmax.f32 %v859_v30, %v2318_v19  ;;  %v2321_v20 = vpop.f32.mrb[50].mxu1 }
 0x289   : > { %2751 = vst [vmem:[#allocation37_spill] sm:$0xff] %v2321_v20  ;;  %v825_v54 = vmax.f32 %v823_v38, %v2321_v20  ;;  %v2324_v15 = vpop.f32.mrb[51].mxu1 }
 0x28a   : > { %2752 = vst [vmem:[#allocation38_spill] sm:$0xff] %v2324_v15  ;;  %v862_v1 = vmax.f32 %v860_v42, %v2324_v15 }
 0x28e   : > { %v2327_v18 = vpop.f32.mrb[52].mxu1 }
 0x28f   : > { %2753 = vst [vmem:[#allocation39_spill] sm:$0xff] %v2327_v18  ;;  %v826_v9 = vmax.f32 %v824_v46, %v2327_v18  ;;  %v2330_v13 = vpop.f32.mrb[53].mxu1 }
 0x290   : > { %2754 = vst [vmem:[#allocation40_spill] sm:$0xff] %v2330_v13  ;;  %v863_v22 = vmax.f32 %v861_v50, %v2330_v13  ;;  %v2333_v62 = vpop.f32.mrb[54].mxu1 }
 0x291   : > { %2755 = vst [vmem:[#allocation41_spill] sm:$0xff] %v2333_v62  ;;  %v827_v30 = vmax.f32 %v825_v54, %v2333_v62  ;;  %v2336_v19 = vpop.f32.mrb[55].mxu1 }
 0x292   : > { %2756 = vst [vmem:[#allocation42_spill] sm:$0xff] %v2336_v19  ;;  %v864_v38 = vmax.f32 %v862_v1, %v2336_v19 }
 0x296   : > { %v2339_v20 = vpop.f32.mrb[56].mxu1 }
 0x297   : > { %2757 = vst [vmem:[#allocation43_spill] sm:$0xff] %v2339_v20  ;;  %v828_v42 = vmax.f32 %v826_v9, %v2339_v20  ;;  %v2342_v15 = vpop.f32.mrb[57].mxu1 }
 0x298   : > { %2758 = vst [vmem:[#allocation44_spill] sm:$0xff] %v2342_v15  ;;  %v865_v46 = vmax.f32 %v863_v22, %v2342_v15  ;;  %v2345_v18 = vpop.f32.mrb[58].mxu1 }
 0x299   : > { %2759 = vst [vmem:[#allocation45_spill] sm:$0xff] %v2345_v18  ;;  %v829_v50 = vmax.f32 %v827_v30, %v2345_v18  ;;  %v2348_v13 = vpop.f32.mrb[59].mxu1 }
 0x29a   : > { %2760 = vst [vmem:[#allocation46_spill] sm:$0xff] %v2348_v13  ;;  %v866_v54 = vmax.f32 %v864_v38, %v2348_v13  ;;  %v880_v38 = vunpack.c.l.s4 %v1881_v56 }
 0x29e   : > { %v2351_v62 = vpop.f32.mrb[60].mxu1 }
 0x29f   : > { %2761 = vst [vmem:[#allocation47_spill] sm:$0xff] %v2351_v62  ;;  %v830_v1 = vmax.f32 %v828_v42, %v2351_v62  ;;  %v794_v19 = vpop.f32.mrb[61].mxu1  ;;  %v881_v62 = vunpack.c.0.s8 %v880_v38 }
 0x2a0   : > { %v867_v0 = vmax.f32 %v865_v46, %v794_v19  ;;  %v2354_v34 = vpop.f32.mrb[62].mxu1  ;;  %v2763_v46 = vlaneseq  ;;  %v2790_v60 = vld [vmem:[#allocation45_spill] sm:$0xff] }
 0x2a1   : > { %2762 = vst [vmem:[#allocation48_spill] sm:$0xff] %v2354_v34  ;;  %v831_v9 = vmax.f32 %v829_v50, %v2354_v34  ;;  %v798_v20 = vpop.f32.mrb[63].mxu1  ;;  %v2791_v58 = vld [vmem:[#allocation46_spill] sm:$0xff] }
 0x2a2   : > { %v868_v22 = vmax.f32 %v866_v54, %v798_v20  ;;  %v2358_v44 = vshrl.u32 %v2763_v46, 7 }
 0x2a3   : > { %v832_v15 = vmax.f32 %v830_v1, %v831_v9 }
 0x2a4   : > { %v869_v26 = vmax.f32 %v867_v0, %v868_v22  ;;  %2764 = vst [vmem:[#allocation49_spill] sm:$0xff] %v2358_v44  ;;  %v884_v0 = vsub.s32 %v881_v62, %v2358_v44  ;;  %v2362_v56 = vsub.s32 0, %v2358_v44 }
 0x2a5   : > { %v833_v14 = vrot.slane %v832_v15, 4 }
 0x2a6   : > { %v870_v30 = vrot.slane %v869_v26, 4  ;;  %2765 = vst [vmem:[#allocation50_spill] sm:$0xff] %v2362_v56 }
 0x2a7   : > { %v834_v18 = vmax.f32 %v832_v15, %v833_v14  ;;  %v801_v15 = vld [vmem:[#allocation3] sm:$0x3] }
 0x2a8   : > { %v871_v6 = vmax.f32 %v869_v26, %v870_v30 }
 0x2a9   : > { %v835_v13 = vrot.slane %v834_v18, 2 }
 0x2aa   : > { %v872_v52 = vrot.slane %v871_v6, 2 }
 0x2ab   : > { %v836_v48 = vmax.f32 %v834_v18, %v835_v13  ;;  %v2706_v13 = vsub.s32 1, %v2358_v44 }
 0x2ac   : > { %v873_v42 = vmax.f32 %v871_v6, %v872_v52 }
 0x2ad   : > { %v837_v40 = vrot.slane %v836_v48, 1 }
 0x2ae   : > { %v874_v50 = vrot.slane %v873_v42, 1 }
 0x2af   : > { %v838_v34 = vmax.f32 %v836_v48, %v837_v40 }
 0x2b0   : > { %v875_v54 = vmax.f32 %v873_v42, %v874_v50 }
 0x2b2   : > { %v878_v1 = vcombine.low %v838_v34, %v875_v54 }
 0x2b4   : > { %v885_v9 = vrot.slane %v878_v1, %v884_v0 }
 0x2b6   : > { %v892_v14 = vrot.slane %v885_v9, %v884_v0 }
 0x2b8   : > { %v894_v18 = vmax.f32 %v801_v15, %v892_v14 }
 0x2ba   : > { %v895_v52 = vsub.f32 %v801_v15, %v894_v18  ;;  %v2366_v6 = vrot.slane %v894_v18, %v2362_v56  ;;  %v2370_v40 = vrot.slane %v894_v18, %v2706_v13  ;;  %1213 = vst.msk [vmem:[#allocation3] sm:$0x3] %vm2179_vm3, %v894_v18 }
 0x2bc   : > { %2766 = vst [vmem:[#allocation51_spill] sm:$0xff] %v2366_v6  ;;  %2767 = vst [vmem:[#allocation52_spill] sm:$0xff] %v2370_v40  ;;  %v970_v62 = vsub.f32 %v794_v19, %v2370_v40  ;;  %v972_v48 = vsub.f32 %v798_v20, %v2370_v40  ;;  %v896_v38 = vmul.f32 1.442695, %v895_v52  ;;  %v914_v19 = vsub.f32 %v2176_v2, %v2370_v40 }
 0x2bd   : > { %v915_v20 = vsub.f32 %v2185_v5, %v2366_v6  ;;  %v916_v46 = vsub.f32 %v2191_v8, %v2370_v40  ;;  %v917_v50 = vsub.f32 %v2195_v10, %v2366_v6  ;;  %v918_v54 = vsub.f32 %v2198_v12, %v2370_v40 }
 0x2be   : > { %v2386_v42 = vpack.c.bf16 %v972_v48, %v970_v62  ;;  %v919_v0 = vsub.f32 %v2201_v16, %v2366_v6  ;;  %v920_v1 = vsub.f32 %v2204_v21, %v2370_v40  ;;  %v921_v2 = vsub.f32 %v2207_v23, %v2366_v6 }
 0x2bf   : > { %v922_v5 = vsub.f32 %v2210_v25, %v2370_v40  ;;  %v923_v8 = vsub.f32 %v2213_v27, %v2366_v6  ;;  %v924_v10 = vsub.f32 %v2216_v29, %v2370_v40  ;;  %v925_v12 = vsub.f32 %v2219_v31, %v2366_v6 }
 0x2c0   : > { %2768 = vst [vmem:[#allocation53_spill] sm:$0xff] %v2386_v42  ;;  %v926_v16 = vsub.f32 %v2222_v33, %v2370_v40  ;;  %1655 = vpow2.f32 %v896_v38  ;;  %v927_v21 = vsub.f32 %v2225_v35, %v2366_v6  ;;  %v928_v23 = vsub.f32 %v2228_v37, %v2370_v40  ;;  %v2776_v38 = vld [vmem:[#allocation32_spill] sm:$0xff] }
 0x2c1   : > { %v929_v25 = vsub.f32 %v2231_v39, %v2366_v6  ;;  %v930_v27 = vsub.f32 %v2234_v41, %v2370_v40  ;;  %v931_v29 = vsub.f32 %v2237_v43, %v2366_v6  ;;  %v932_v31 = vsub.f32 %v2240_v45, %v2370_v40 }
 0x2c2   : > { %v933_v33 = vsub.f32 %v2243_v47, %v2366_v6  ;;  %v934_v35 = vsub.f32 %v2246_v49, %v2370_v40  ;;  %v935_v37 = vsub.f32 %v2249_v51, %v2366_v6  ;;  %v936_v39 = vsub.f32 %v2252_v53, %v2370_v40 }
 0x2c3   : > { %v937_v41 = vsub.f32 %v2255_v55, %v2366_v6  ;;  %v938_v43 = vsub.f32 %v2258_v57, %v2370_v40  ;;  %v939_v45 = vsub.f32 %v2261_v4, %v2366_v6  ;;  %v940_v47 = vsub.f32 %v2264_v7, %v2370_v40  ;;  %v2769_v7 = vld [vmem:[#allocation25_spill] sm:$0xff] }
 0x2c4   : > { %v941_v49 = vsub.f32 %v2267_v11, %v2366_v6  ;;  %v942_v51 = vsub.f32 %v2270_v17, %v2370_v40  ;;  %v943_v53 = vsub.f32 %v2273_v24, %v2366_v6  ;;  %v944_v55 = vsub.f32 %v2276_v28, %v2370_v40  ;;  %v2770_v11 = vld [vmem:[#allocation26_spill] sm:$0xff]  ;;  %v2771_v17 = vld [vmem:[#allocation27_spill] sm:$0xff]  ;;  %v2772_v24 = vld [vmem:[#allocation28_spill] sm:$0xff] }
 0x2c5   : > { %v945_v57 = vsub.f32 %v2279_v32, %v2366_v6  ;;  %v946_v4 = vsub.f32 %v2282_v36, %v2370_v40  ;;  %v947_v9 = vsub.f32 %v2769_v7, %v2366_v6  ;;  %v948_v15 = vsub.f32 %v2770_v11, %v2370_v40  ;;  %v2773_v28 = vld [vmem:[#allocation29_spill] sm:$0xff]  ;;  %v2774_v32 = vld [vmem:[#allocation30_spill] sm:$0xff]  ;;  %v2775_v36 = vld [vmem:[#allocation31_spill] sm:$0xff] }
 0x2c6   : > { %v949_v14 = vsub.f32 %v2771_v17, %v2366_v6  ;;  %v950_v18 = vsub.f32 %v2772_v24, %v2370_v40  ;;  %v951_v52 = vsub.f32 %v2773_v28, %v2366_v6  ;;  %v952_v62 = vsub.f32 %v2774_v32, %v2370_v40  ;;  %v2777_v11 = vld [vmem:[#allocation33_spill] sm:$0xff]  ;;  %v2778_v17 = vld [vmem:[#allocation34_spill] sm:$0xff]  ;;  %v2779_v24 = vld [vmem:[#allocation35_spill] sm:$0xff] }
 0x2c7   : > { %v953_v48 = vsub.f32 %v2775_v36, %v2366_v6  ;;  %v954_v7 = vsub.f32 %v2776_v38, %v2370_v40  ;;  %v955_v13 = vsub.f32 %v2777_v11, %v2366_v6  ;;  %v956_v3 = vsub.f32 %v2778_v17, %v2370_v40  ;;  %v2780_v28 = vld [vmem:[#allocation36_spill] sm:$0xff]  ;;  %v2781_v32 = vld [vmem:[#allocation37_spill] sm:$0xff]  ;;  %v2782_v36 = vld [vmem:[#allocation38_spill] sm:$0xff] }
 0x2c8   : > { %v957_v30 = vsub.f32 %v2779_v24, %v2366_v6  ;;  %v958_v34 = vsub.f32 %v2780_v28, %v2370_v40  ;;  %v959_v22 = vsub.f32 %v2781_v32, %v2366_v6  ;;  %v960_v26 = vsub.f32 %v2782_v36, %v2370_v40  ;;  %v2783_v38 = vld [vmem:[#allocation39_spill] sm:$0xff]  ;;  %v2784_v11 = vld [vmem:[#allocation40_spill] sm:$0xff]  ;;  %v2785_v17 = vld [vmem:[#allocation41_spill] sm:$0xff] }
 0x2c9   : > { %v961_v56 = vsub.f32 %v2783_v38, %v2366_v6  ;;  %v962_v42 = vsub.f32 %v2784_v11, %v2370_v40  ;;  %v963_v44 = vsub.f32 %v2785_v17, %v2366_v6  ;;  %v2786_v24 = vld [vmem:[#allocation42_spill] sm:$0xff]  ;;  %v2787_v28 = vld [vmem:[#allocation43_spill] sm:$0xff]  ;;  %v2789_v32 = vld [vmem:[#allocation44_spill] sm:$0xff]  ;;  %v967_v38 = vsub.f32 %v2790_v60, %v2366_v6 }
 0x2ca   : > { %v964_v63 = vsub.f32 %v2786_v24, %v2370_v40  ;;  %v965_v61 = vsub.f32 %v2787_v28, %v2366_v6  ;;  %v2492_v59 = vpop.eup %1655  ;;  %v966_v36 = vsub.f32 %v2789_v32, %v2370_v40  ;;  %v968_v11 = vsub.f32 %v2791_v58, %v2370_v40  ;;  %v2792_v17 = vld [vmem:[#allocation47_spill] sm:$0xff]  ;;  %v2793_v28 = vld [vmem:[#allocation48_spill] sm:$0xff]  ;;  %v2796_v40 = vld [vmem:[#allocation22_spill] sm:$0xff] }
 0x2cb   : > { %2788 = vst [vmem:[#allocation25_spill] sm:$0xff] %v2492_v59  ;;  %v969_v24 = vsub.f32 %v2792_v17, %v2366_v6  ;;  %v971_v59 = vsub.f32 %v2793_v28, %v2366_v6  ;;  %v2794_v32 = vld [vmem:[#allocation20_spill] sm:$0xff]  ;;  %v2797_v58 = vsub.f32 %v2796_v40, %v2366_v6  ;;  %v2798_v28 = vld [vmem:[#allocation21_spill] sm:$0xff]  ;;  %v2801_v40 = vld [vmem:[#allocation23_spill] sm:$0xff] }
 0x2cc   : > { %v2795_v60 = vsub.f32 %v2794_v32, %v2366_v6  ;;  %v2799_v32 = vld [vmem:[#allocation52_spill] sm:$0xff] }
 0x2cd   : > { %v2800_v6 = vsub.f32 %v2798_v28, %v2799_v32  ;;  %v2803_v28 = vld [vmem:[#allocation24_spill] sm:$0xff] }
 0x2ce   : > { %v973_v17 = vpack.c.bf16 %v2797_v58, %v2795_v60  ;;  %v2802_v58 = vsub.f32 %v2801_v40, %v2799_v32  ;;  %v2804_v32 = vld [vmem:[#allocation51_spill] sm:$0xff] }
 0x2cf   : > { %v2805_v40 = vsub.f32 %v2803_v28, %v2804_v32  ;;  %v977_v28 = vpack.c.bf16 %v919_v0, %v917_v50  ;;  %v978_v32 = vpack.c.bf16 %v920_v1, %v918_v54  ;;  %v983_v0 = vpack.c.bf16 %v931_v29, %v929_v25 }
 0x2d0   : > { %v974_v60 = vpack.c.bf16 %v2802_v58, %v2800_v6  ;;  %v976_v58 = vpack.c.bf16 %v916_v46, %v914_v19  ;;  %v981_v19 = vpack.c.bf16 %v927_v21, %v925_v12  ;;  %v982_v46 = vpack.c.bf16 %v928_v23, %v926_v16 }
 0x2d1   : > { %v975_v6 = vpack.c.bf16 %v915_v20, %v2805_v40  ;;  %v979_v20 = vpack.c.bf16 %v923_v8, %v921_v2  ;;  %v980_v40 = vpack.c.bf16 %v924_v10, %v922_v5  ;;  %v984_v50 = vpack.c.bf16 %v932_v31, %v930_v27 }
 0x2d2   : > { %v2519_v1 = vpack.c.bf16 %v935_v37, %v933_v33  ;;  %v986_v54 = vpack.c.bf16 %v936_v39, %v934_v35  ;;  %v2521_v2 = vpack.c.bf16 %v939_v45, %v937_v41  ;;  %v2523_v8 = vpack.c.bf16 %v940_v47, %v938_v43  ;;  %v2806_v47 = vld [vmem:[#allocation49_spill] sm:$0xff] }
 0x2d3   : > { %v2525_v5 = vpack.c.bf16 %v943_v53, %v941_v49  ;;  %v2527_v10 = vpack.c.bf16 %v944_v55, %v942_v51  ;;  %v2529_v12 = vpack.c.bf16 %v947_v9, %v945_v57  ;;  %v2531_v21 = vpack.c.bf16 %v948_v15, %v946_v4  ;;  %v2808_v49 = vld [vmem:[#allocation25_spill] sm:$0xff] }
 0x2d4   : > { %v2533_v16 = vpack.c.bf16 %v951_v52, %v949_v14  ;;  %v2535_v23 = vpack.c.bf16 %v952_v62, %v950_v18  ;;  %v2537_v25 = vpack.c.bf16 %v955_v13, %v953_v48  ;;  %v2539_v27 = vpack.c.bf16 %v956_v3, %v954_v7 }
 0x2d5   : > { %v2541_v29 = vpack.c.bf16 %v959_v22, %v957_v30  ;;  %v2543_v31 = vpack.c.bf16 %v960_v26, %v958_v34  ;;  %v2545_v33 = vpack.c.bf16 %v963_v44, %v961_v56  ;;  %v2547_v35 = vpack.c.bf16 %v964_v63, %v962_v42 }
 0x2d6   : > { %v2549_v37 = vpack.c.bf16 %v967_v38, %v965_v61  ;;  %v2551_v39 = vpack.c.bf16 %v968_v11, %v966_v36  ;;  %v2553_v41 = vpack.c.bf16 %v971_v59, %v969_v24  ;;  %v1006_v43 = vmul.bf16 1069105081, %v973_v17 }
 0x2d7   : > { %v1009_v45 = vmul.bf16 1069105081, %v974_v60  ;;  %v1015_v13 = vmul.bf16 1069105081, %v976_v58  ;;  %v2807_v3 = vsub.s32 1, %v2806_v47 }
 0x2d8   : > { %1657 = vpow.bf16 %v1006_v43  ;;  %v1012_v44 = vmul.bf16 1069105081, %v975_v6  ;;  %v1021_v63 = vmul.bf16 1069105081, %v978_v32  ;;  %v1018_v61 = vmul.bf16 1069105081, %v977_v28 }
 0x2d9   : > { %v2558_v22 = vrot.slane %v2808_v49, %v2807_v3  ;;  %1659 = vpow.bf16 %v1009_v45  ;;  %v1027_v56 = vmul.bf16 1069105081, %v980_v40  ;;  %v1024_v59 = vmul.bf16 1069105081, %v979_v20 }
 0x2da   : > { %1661 = vpow.bf16 %v1015_v13  ;;  %v1033_v34 = vmul.bf16 1069105081, %v982_v46  ;;  %v1030_v51 = vmul.bf16 1069105081, %v981_v19  ;;  %v1039_v53 = vmul.bf16 1069105081, %v984_v50 }
 0x2db   : > { %1663 = vpow.bf16 %v1012_v44  ;;  %v1036_v4 = vmul.bf16 1069105081, %v983_v0  ;;  %v1045_v9 = vmul.bf16 1069105081, %v986_v54  ;;  %v1042_v18 = vmul.bf16 1069105081, %v2519_v1 }
 0x2dc   : > { %1665 = vpow.bf16 %v1021_v63  ;;  %v1051_v52 = vmul.bf16 1069105081, %v2523_v8  ;;  %v1048_v7 = vmul.bf16 1069105081, %v2521_v2  ;;  %v1057_v36 = vmul.bf16 1069105081, %v2527_v10 }
 0x2dd   : > { %1667 = vpow.bf16 %v1018_v61  ;;  %v1054_v24 = vmul.bf16 1069105081, %v2525_v5  ;;  %v1063_v17 = vmul.bf16 1069105081, %v2531_v21  ;;  %v1060_v58 = vmul.bf16 1069105081, %v2529_v12 }
 0x2de   : > { %1669 = vpow.bf16 %v1027_v56  ;;  %v1069_v28 = vmul.bf16 1069105081, %v2535_v23  ;;  %v1066_v40 = vmul.bf16 1069105081, %v2533_v16  ;;  %v1075_v19 = vmul.bf16 1069105081, %v2539_v27 }
 0x2df   : > { %1671 = vpow.bf16 %v1024_v59  ;;  %v1072_v50 = vmul.bf16 1069105081, %v2537_v25  ;;  %v1081_v1 = vmul.bf16 1069105081, %v2543_v31  ;;  %v1078_v8 = vmul.bf16 1069105081, %v2541_v29 }
 0x2e0   : > { %1673 = vpow.bf16 %v1033_v34  ;;  %v1087_v5 = vmul.bf16 1069105081, %v2547_v35  ;;  %v1084_v21 = vmul.bf16 1069105081, %v2545_v33  ;;  %v1093_v16 = vmul.bf16 1069105081, %v2551_v39 }
 0x2e1   : > { %1675 = vpow.bf16 %v1030_v51  ;;  %v1090_v27 = vmul.bf16 1069105081, %v2549_v37  ;;  %v2809_v29 = vld [vmem:[#allocation53_spill] sm:$0xff]  ;;  %v1096_v33 = vmul.bf16 1069105081, %v2553_v41  ;;  %v2810_v63 = vld [vmem:[#allocation15_spill] sm:$0xff] }
 0x2e2   : > { %1677 = vpow.bf16 %v1039_v53  ;;  %v1099_v31 = vmul.bf16 1069105081, %v2809_v29  ;;  %v2811_v41 = vld [vmem:[#allocation17_spill] sm:$0xff]  ;;  %v2812_v61 = vld [vmem:[#allocation16_spill] sm:$0xff]  ;;  %v2813_v56 = vld [vmem:[#allocation19_spill] sm:$0xff]  ;;  %v1123_v53 = vmul.f32 0.0, %v2558_v22 }
 0x2e3   : > { %v1658_v26 = vpop.eup %1657  ;;  %1679 = vpow.bf16 %v1036_v4  ;;  %v2814_v59 = vld [vmem:[#allocation18_spill] sm:$0xff] }
 0x2e4   : > { %v1660_v30 = vpop.eup %1659  ;;  %1681 = vpow.bf16 %v1045_v9  ;;  %v2816_v34 = vld [vmem:[#allocation50_spill] sm:$0xff] }
 0x2e5   : > { %1132 = vmatprep.subr.bf16.mxu0 %v1660_v30  ;;  %v1662_v42 = vpop.eup %1661  ;;  %1683 = vpow.bf16 %v1042_v18  ;;  %v1115_v30 = vrot.slane %v2808_v49, %v2816_v34 }
 0x2e6   : > { %1133 = vmatpush1.bf16.msra.mxu0 %v1658_v26  ;;  %v1664_v55 = vpop.eup %1663  ;;  %1685 = vpow.bf16 %v1051_v52  ;;  %v2815_v26 = vmov 0  }
 0x2e7   : > { %1134 = vmatprep.subr.bf16.mxu0 %v1662_v42  ;;  %v1666_v57 = vpop.eup %1665  ;;  %1687 = vpow.bf16 %v1048_v7  ;;  %v1122_v42 = vmul.f32 0.0, %v1115_v30 }
 0x2e8   : > { %v1668_v15 = vpop.eup %1667  ;;  %1689 = vpow.bf16 %v1057_v36 }
 0x2e9   : > { %v1670_v14 = vpop.eup %1669  ;;  %1691 = vpow.bf16 %v1054_v24 }
 0x2ea   : > { %1135 = vmatpush1.bf16.msra.mxu0 %v1664_v55  ;;  %v1672_v62 = vpop.eup %1671  ;;  %1693 = vpow.bf16 %v1063_v17 }
 0x2eb   : > { %1136 = vmatprep.subr.bf16.mxu0 %v1666_v57  ;;  %v1674_v48 = vpop.eup %1673  ;;  %1695 = vpow.bf16 %v1060_v58 }
 0x2ec   : > { %v1676_v38 = vpop.eup %1675  ;;  %1697 = vpow.bf16 %v1069_v28 }
 0x2ed   : > { %v1678_v11 = vpop.eup %1677  ;;  %1699 = vpow.bf16 %v1066_v40 }
 0x2ee   : > { %1137 = vmatpush1.bf16.msra.mxu0 %v1668_v15  ;;  %v1680_v60 = vpop.eup %1679  ;;  %1701 = vpow.bf16 %v1075_v19 }
 0x2ef   : > { %1138 = vmatprep.subr.bf16.mxu0 %v1670_v14  ;;  %v1682_v6 = vpop.eup %1681  ;;  %1703 = vpow.bf16 %v1072_v50 }
 0x2f0   : > { %v1684_v32 = vpop.eup %1683  ;;  %1705 = vpow.bf16 %v1081_v1 }
 0x2f1   : > { %v1686_v20 = vpop.eup %1685  ;;  %1707 = vpow.bf16 %v1078_v8 }
 0x2f2   : > { %1139 = vmatpush1.bf16.msra.mxu0 %v1672_v62  ;;  %v1688_v46 = vpop.eup %1687  ;;  %1709 = vpow.bf16 %v1087_v5 }
 0x2f3   : > { %1140 = vmatprep.subr.bf16.mxu0 %v1674_v48  ;;  %v1690_v0 = vpop.eup %1689  ;;  %1711 = vpow.bf16 %v1084_v21 }
 0x2f4   : > { %v1692_v54 = vpop.eup %1691  ;;  %1713 = vpow.bf16 %v1093_v16 }
 0x2f5   : > { %v1694_v2 = vpop.eup %1693  ;;  %1715 = vpow.bf16 %v1090_v27 }
 0x2f6   : > { %1141 = vmatpush1.bf16.msra.mxu0 %v1676_v38  ;;  %v1696_v10 = vpop.eup %1695  ;;  %1717 = vpow.bf16 %v1099_v31  ;;  %v1653_v31 = vld [vmem:[%s2670_s4] sm:$0xff]  }
 0x2f7   : > { %1142 = vmatprep.subr.bf16.mxu0 %v1678_v11  ;;  %v1698_v12 = vpop.eup %1697  ;;  %1719 = vpow.bf16 %v1096_v33 }
 0x2f8   : > { %v1700_v23 = vpop.eup %1699 }
 0x2f9   : > { %v1702_v25 = vpop.eup %1701 }
 0x2fa   : > { %1143 = vmatpush1.bf16.msra.mxu0 %v1680_v60  ;;  %v1704_v35 = vpop.eup %1703 }
 0x2fb   : > { %1144 = vmatprep.subr.bf16.mxu0 %v1682_v6  ;;  %v1706_v43 = vpop.eup %1705 }
 0x2fc   : > { %v1708_v39 = vpop.eup %1707 }
 0x2fd   : > { %v1710_v45 = vpop.eup %1709 }
 0x2fe   : > { %1145 = vmatpush1.bf16.msra.mxu0 %v1684_v32  ;;  %v1712_v13 = vpop.eup %1711 }
 0x2ff   : > { %1146 = vmatprep.subr.bf16.mxu0 %v1686_v20  ;;  %v1714_v37 = vpop.eup %1713 }
 0x300   : > { %v1716_v47 = vpop.eup %1715 }
 0x301   : > { %v1718_v3 = vpop.eup %1717 }
 0x302   : > { %1147 = vmatpush1.bf16.msra.mxu0 %v1688_v46  ;;  %v1720_v44 = vpop.eup %1719 }
 0x303   : > { %1148 = vmatprep.subr.bf16.mxu0 %v1690_v0 }
 0x306   : > { %1149 = vmatpush1.bf16.msra.mxu0 %v1692_v54 }
 0x307   : > { %1150 = vmatprep.subr.bf16.mxu0 %v1694_v2 }
 0x30a   : > { %1151 = vmatpush1.bf16.msra.mxu0 %v1696_v10 }
 0x30b   : > { %1152 = vmatprep.subr.bf16.mxu0 %v1698_v12 }
 0x30e   : > { %1153 = vmatpush1.bf16.msra.mxu0 %v1700_v23 }
 0x30f   : > { %1154 = vmatprep.subr.bf16.mxu0 %v1702_v25 }
 0x312   : > { %1155 = vmatpush1.bf16.msra.mxu0 %v1704_v35  ;;  %v1654_v35 = vld [vmem:[%s2670_s4 + $0x8] sm:$0xff]  }
 0x313   : > { %1156 = vmatprep.subr.bf16.mxu0 %v1706_v43  ;;  %v1330_v43 = vstv %s1329_s10 }
 0x316   : > { %1157 = vmatpush1.bf16.msra.mxu0 %v1708_v39  ;;  %v1339_v39 = vld [vmem:[%s2080_s28] sm:$0xff] }
 0x317   : > { %1158 = vmatprep.subr.bf16.mxu0 %v1710_v45 }
 0x31a   : > { %1159 = vmatpush1.bf16.msra.mxu0 %v1712_v13 }
 0x31b   : > { %1160 = vmatprep.subr.bf16.mxu0 %v1714_v37  ;;  %v1340_v37 = vld [vmem:[%s2080_s28 + $0x8] sm:$0xff] }
 0x31e   : > { %1161 = vmatpush1.bf16.msra.mxu0 %v1716_v47 }
 0x31f   : > { %1162 = vmatprep.subr.bf16.mxu0 %v1718_v3 }
 0x322   : > { %1163 = vmatpush1.bf16.msra.mxu0 %v1720_v44  ;;  %v1341_v44 = vld [vmem:[%s2080_s28 + $0x10] sm:$0xff] }
 0x325   : > { %1165 = vmatmul.mubr.bf16.vlgmr.msra.gmra.mrb[12].mxu0 %v2810_v63 }
 0x326   : > { %1174 = vmatprep.mubr.bf16.mxu0 %v2811_v41 }
 0x32d   : > { %1175 = vmatmul.mubr.bf16.gmra.mrb[16].mxu0 %v2812_v61 }
 0x32e   : > { %1184 = vmatprep.mubr.bf16.mxu0 %v2813_v56  ;;  %v1342_v56 = vld [vmem:[%s2080_s28 + $0x18] sm:$0xff] }
 0x335   : > { %1185 = vmatmul.mubr.bf16.gmra.mrb[20].mxu0 %v2814_v59 }
 0x336   : > { %1308 = vmatprep.mubr.bf16.mxu0 %v2815_v26 }
 0x3f8   : > { %v1166_v51 = vpop.f32.mrb[12].mxu0 }
 0x3f9   : > { %v1193_v55 = vadd.f32 %v1166_v51, %v1122_v42  ;;  %v1168_v57 = vpop.f32.mrb[13].mxu0  ;;  %v1343_v51 = vld [vmem:[%s2080_s28 + $0x20] sm:$0xff] }
 0x3fa   : > { %v1194_v4 = vadd.f32 %v1168_v57, %v1123_v53  ;;  %v1170_v9 = vpop.f32.mrb[14].mxu0  ;;  %v1344_v57 = vld [vmem:[%s2080_s28 + $0x28] sm:$0xff] }
 0x3fb   : > { %v1195_v15 = vadd.f32 %v1170_v9, %v1122_v42  ;;  %v1172_v14 = vpop.f32.mrb[15].mxu0 }
 0x3fc   : > { %v1196_v18 = vadd.f32 %v1172_v14, %v1123_v53 }
 0x400   : > { %v1176_v52 = vpop.f32.mrb[16].mxu0 }
 0x401   : > { %v1197_v62 = vadd.f32 %v1176_v52, %v1122_v42  ;;  %v1178_v48 = vpop.f32.mrb[17].mxu0 }
 0x402   : > { %v1198_v7 = vadd.f32 %v1178_v48, %v1123_v53  ;;  %v1180_v36 = vpop.f32.mrb[18].mxu0 }
 0x403   : > { %v1199_v38 = vadd.f32 %v1180_v36, %v1122_v42  ;;  %v1182_v11 = vpop.f32.mrb[19].mxu0 }
 0x404   : > { %v1200_v24 = vadd.f32 %v1182_v11, %v1123_v53 }
 0x408   : > { %v1186_v49 = vpop.f32.mrb[20].mxu0 }
 0x409   : > { %v1201_v17 = vadd.f32 %v1186_v49, %v1122_v42  ;;  %v1188_v60 = vpop.f32.mrb[21].mxu0 }
 0x40a   : > { %v1202_v6 = vadd.f32 %v1188_v60, %v1123_v53  ;;  %v1190_v22 = vpop.f32.mrb[22].mxu0 }
 0x40b   : > { %1721 = vrcp.f32 %v1201_v17  ;;  %v1191_v58 = vpop.f32.mrb[23].mxu0 }
 0x40c   : > { %1723 = vrcp.f32 %v1202_v6 }
 0x415   : > { %v1722_v28 = vpop.eup %1721 }
 0x416   : > { %v1724_v32 = vpop.eup %1723  ;;  %v1229_v20 = vrot.slane %v1722_v28, %v2816_v34 }
 0x417   : > { %v1233_v40 = vrot.slane %v1724_v32, %v2816_v34 }
 0x418   : > { %v1234_v19 = vmul.f32 %v1229_v20, %v1193_v55  ;;  %v1236_v46 = vmul.f32 %v1229_v20, %v1195_v15  ;;  %v1238_v0 = vmul.f32 %v1229_v20, %v1197_v62  ;;  %v1240_v5 = vmul.f32 %v1229_v20, %v1199_v38  ;;  %v1345_v15 = vld [vmem:[%s2080_s28 + $0x30] sm:$0xff]  ;;  %v1346_v62 = vld [vmem:[%s2080_s28 + $0x38] sm:$0xff]  ;;  %s1785_s28 = scalar_lea.vmem %s2612_s29, 1024 }
 0x419   : > { %v1235_v50 = vmul.f32 %v1233_v40, %v1194_v4  ;;  %v1237_v1 = vmul.f32 %v1233_v40, %v1196_v18  ;;  %v1239_v54 = vmul.f32 %v1233_v40, %v1198_v7  ;;  %v1241_v8 = vmul.f32 %v1233_v40, %v1200_v24  ;;  %p1786_p0 = scmp.ne.s32.totalorder %s2612_s29, %s1785_s28  ;;  %p1793_p10 = scmp.lt.s32.totalorder %s1791_s14, %s1785_s28 }
 0x41a   : > { %v1244_v2 = vpack.c.bf16 %v1236_v46, %v1234_v19  ;;  %v1246_v21 = vpack.c.bf16 %v1240_v5, %v1238_v0  ;;  %v1242_v16 = vmul.f32 %v1229_v20, %v1201_v17  ;;  %v1243_v23 = vmul.f32 %v1233_v40, %v1202_v6 }
 0x41b   : > { %v1245_v10 = vpack.c.bf16 %v1237_v1, %v1235_v50  ;;  %v1247_v12 = vpack.c.bf16 %v1241_v8, %v1239_v54  ;;  %p1787_p11 = pnand %p1786_p0, %p2817_p3  ;;  %p1794_p12 = por %p1793_p10, %p1792_p7 }
 0x41c   : > { %v1248_v25 = vpack.c.bf16 %v1242_v16, %v1242_v16  ;;  %v1249_v27 = vpack.c.bf16 %v1243_v23, %v1243_v23 }
 0x41d   : > { %1276 = vmatprep.subr.bf16.mxu0 %v1245_v10  ;;  %p1788_p13 = pneg %p1787_p11 }
 0x41e   : > { %1277 = vmatpush1.bf16.msra.mxu0 %v1244_v2  ;;  %v1271_v29 = vsel %vm601_vm1, %v1248_v25, 0 }
 0x41f   : > { %1278 = vmatprep.subr.bf16.mxu0 %v1247_v12  ;;  %p1795_p9 = pnand %p1794_p12, %p1788_p13 }
 0x422   : > { %1279 = vmatpush1.bf16.msra.mxu0 %v1246_v21 }
 0x423   : > { %1542 = vmatprep.subr.msk.bf16.mxu0 %vm601_vm1, %v1249_v27 }
 0x426   : > { %1281 = vmatpush1.bf16.msra.mxu0 %v1271_v29 }
 0x429   : > { %1543 = vmatmul.mubr.msk.bf16.vlgmr.msra.gmra.mrb[24].mxu0 %vm552_vm2, %v1653_v31 }
 0x42a   : > { %1318 = vmatprep.mubr.bf16.mxu0 %v2815_v26 }
 0x431   : > { %1544 = vmatmul.mubr.msk.bf16.gmra.mrb[28].mxu0 %vm552_vm2, %v1654_v35 }
 0x4fc   : > { %v1310_v33 = vpop.f32.mrb[24].mxu0 }
 0x4fd   : > { %v1331_v45 = vmul.f32 %v1330_v43, %v1310_v33  ;;  %v1312_v13 = vpop.f32.mrb[25].mxu0 }
 0x4fe   : > { %v1332_v47 = vmul.f32 %v1330_v43, %v1312_v13  ;;  %v1314_v3 = vpop.f32.mrb[26].mxu0 }
 0x4ff   : > { %v1347_v63 = vadd.f32 %v1339_v39, %v1331_v45  ;;  %v1333_v41 = vmul.f32 %v1330_v43, %v1314_v3  ;;  %v1316_v61 = vpop.f32.mrb[27].mxu0 }
 0x500   : > { %v1348_v59 = vadd.f32 %v1340_v37, %v1332_v47  ;;  %v1334_v26 = vmul.f32 %v1330_v43, %v1316_v61 }
 0x501   : > { %1355 = vst [vmem:[%s301_s18] sm:$0xff] %v1347_v63  ;;  %v1349_v34 = vadd.f32 %v1341_v44, %v1333_v41 }
 0x502   : > { %1356 = vst [vmem:[%s301_s18 + $0x8] sm:$0xff] %v1348_v59  ;;  %v1350_v30 = vadd.f32 %v1342_v56, %v1334_v26 }
 0x503   : > { %1357 = vst [vmem:[%s301_s18 + $0x10] sm:$0xff] %v1349_v34 }
 0x504   : > { %1358 = vst [vmem:[%s301_s18 + $0x18] sm:$0xff] %v1350_v30  ;;  %v1320_v42 = vpop.f32.mrb[28].mxu0 }
 0x505   : > { %v1335_v53 = vmul.f32 %v1330_v43, %v1320_v42  ;;  %v1322_v55 = vpop.f32.mrb[29].mxu0 }
 0x506   : > { %v1336_v4 = vmul.f32 %v1330_v43, %v1322_v55  ;;  %v1324_v9 = vpop.f32.mrb[30].mxu0 }
 0x507   : > { %v1351_v14 = vadd.f32 %v1343_v51, %v1335_v53  ;;  %v1337_v18 = vmul.f32 %v1330_v43, %v1324_v9  ;;  %v1326_v52 = vpop.f32.mrb[31].mxu0 }
 0x508   : > { %v1352_v48 = vadd.f32 %v1344_v57, %v1336_v4  ;;  %v1338_v7 = vmul.f32 %v1330_v43, %v1326_v52 }
 0x509   : > { %1359 = vst [vmem:[%s301_s18 + $0x20] sm:$0xff] %v1351_v14  ;;  %v1353_v36 = vadd.f32 %v1345_v15, %v1337_v18 }
 0x50a   : > { %1360 = vst [vmem:[%s301_s18 + $0x28] sm:$0xff] %v1352_v48  ;;  %v1354_v38 = vadd.f32 %v1346_v62, %v1338_v7 }
 0x50b   : > { %1361 = vst [vmem:[%s301_s18 + $0x30] sm:$0xff] %v1353_v36 }
 0x50c   : > { %1362 = vst [vmem:[%s301_s18 + $0x38] sm:$0xff] %v1354_v38 }
 0x50d   : > { %1798 = shalt.err (!%p1795_p9)
}
 0x50e   : > { %s1799_s19 = scalar_lea.hbm %s2617_s16, 1024  ;;  %s1803_s11 = scalar_lea.hbm %s2671_s5, 2048 }
 0x50f   : > { %p1800_p1 = scmp.ne.s32.totalorder %s2617_s16, %s1799_s19  ;;  %p1804_p5 = scmp.lt.u32.totalorder %s2617_s16, %s2671_s5 }
 0x510   : > { %p1805_p4 = scmp.lt.u32.totalorder %s1803_s11, %s1799_s19  ;;  %p1807_p0 = scmp.lt.u32.totalorder %s1799_s19, %s2617_s16 }
 0x511   : > { %p1801_p6 = pnand %p1800_p1, %p2817_p3 }
 0x512   : > { %p1806_p8 = por %p1805_p4, %p1804_p5 }
 0x513   : > { %p1802_p2 = pneg %p1801_p6 }
 0x514   : > { %p1808_p11 = por %p1807_p0, %p1806_p8 }
 0x516   : > { %p1809_p13 = pnand %p1808_p11, %p1802_p2 }
 0x518   : > { %1812 = shalt.err (!%p1809_p13)
}
 0x519   : > { %s1883_s6 = smov 256   ;;  %s1884_s30 = smov 16  }
 0x51a   : > { %1570 = dma.vmem_to_hbm [thread:$0]  (%p2817_p3), %s2612_s29, 1024, %s2617_s16, %s1364_s23, %s1883_s6, %s1883_s6, %s1884_s30  }
 0x51b PF: > { %s1394_s13 = sand.u32 1, %s1851_s20   ;;  %p2818_p7 = scmp.ne.s32.totalorder %s2722_s9, 0 }
 0x51c   : > { %p2819_p10 = scmp.ge.s32.totalorder %s1871_s25, 2  ;;  %s1395_s28 = scalar_lea.sflag [#allocation8], %s1394_s13 }
 0x51e   : > { %p1580_p12 = pnand %p2819_p10, %p2818_p7 }
 0x520   : > { %1846 = dma.done.wait (!%p1580_p12), %s1395_s28, 1024  }
 0x521   : > { %1848 = vsyncadd (!%p1580_p12), %s1395_s28, 4294966272  ;;  %s25_s25 = sadd.s32 1, %s1871_s25   ;;  %s2820_s20 = smov %s1855_s21 }
 0x522   : > { %p22_p9 = scmp.ge.s32.totalorder %s25_s25, 4   ;;  %s2821_s21 = smov %s1859_s22 }
 0x523   : > { %s2822_s22 = smov %s1974_s8  ;;  %s2823_s23 = smov %s1867_s24 }
 0x524   : > { %s2824_s24 = smov %s2826_s27  ;;  %24 = sbr.rel (!%p22_p9) target bundleno = 10 (0xa), region = 98 }
 0x52b   :  { %1400 = vsyncpa [#allocation7], 1 }
 0x52c   :  { %1402 = vsyncpa [#allocation7 + $0x1], 1 }
 0x52d   :  { %1403 = vsyncpa [#allocation10], 1 }
 0x52e   :  { %1405 = vsyncpa [#allocation10 + $0x1], 1 }
 0x52f   :  { %1406 = vsyncpa [#allocation8], 1 }
 0x530   :  { %1408 = vsyncpa [#allocation8 + $0x1], 1 }

</bundles_post_ra>
